<compile_context>
chip_gen: v7x
topology: tpu7x:2x2x1
jax: 0.10.0
libtpu: 0.0.40
codegen_flags: <defaults>
</compile_context>

<pallas_src>
import jax
import jax.numpy as jnp
from jax.experimental import pallas as pl
from jax.experimental.pallas import tpu as pltpu
import numpy as np

LANE = 128      # per-gate lane padding (one vreg lane width)
SUBLANE = 8     # batch rows per program, padded to a full sublane tile
# PyTorch LSTM gate order is [i, f, g, o]; kernel uses [i, f, o, g].
_GATE_PERM = (0, 1, 3, 2)


def _round_up(n, m):
    return ((n + m - 1) // m) * m


def lstm_last_linear_kernel(x_ref, w_ih_ref, w_hh_ref, b_ref,
                            w_out_ref, b_out_ref, out_ref, xp_ref):
    # x_ref:     (T, BB, F)    time-major input block (one batch block)
    # w_ih_ref:  (F, 4*Hp)     W_ih^T, gates [i,f,o,g], each padded to Hp lanes (f32)
    # w_hh_ref:  (Hp, 4*Hp)    W_hh^T, padded rows/cols zero (bf16)
    # b_ref:     (1, 4*Hp)     b_ih + b_hh, padded lanes zero (f32)
    # w_out_ref: (Hp, Fp)      W_out^T, padded rows/cols zero (f32)
    # b_out_ref: (1, Fp)
    # out_ref:   (BB, Fp)
    # xp_ref:    (T, BB, 4*Hp) VMEM scratch for the hoisted input projection
    T, BB, F = x_ref.shape
    Hp = w_hh_ref.shape[0]

    # ---- Hoisted input projection (off the serial h-chain): T small static
    #      matmuls with the combined bias folded in, staged in VMEM scratch so
    #      the unrolled recurrence only pulls one (BB, 4Hp) tile per step. ----
    w_ih = w_ih_ref[...]
    b = b_ref[...]
    for t in range(T):                     # T is small & static: unrolled at trace time
        xp_ref[t] = jnp.dot(x_ref[t], w_ih,
                            preferred_element_type=jnp.float32) + b

    # ---- Recurrence: only the h-dependent matmul (bf16 operands, f32
    #      accumulate) remains on the critical path. ----
    w_hh = w_hh_ref[...]                   # (Hp, 4Hp) bf16
    h = jnp.zeros((BB, Hp), jnp.float32)
    c = jnp.zeros((BB, Hp), jnp.float32)
    # TODO(synk): hold W_hh weight-stationary in the MXU across the unrolled
    # steps (pltpu.matmul_push_rhs / matmul_acc_lhs / matmul_pop) to avoid
    # re-streaming it from VMEM every step.
    for t in range(T):
        gates = xp_ref[t] + jnp.dot(h.astype(jnp.bfloat16), w_hh,
                                    preferred_element_type=jnp.float32)  # (BB, 4Hp) f32
        # One sigmoid over the lane-aligned [i, f, o] slots, one tanh over g.
        sig = jax.nn.sigmoid(gates[:, :3 * Hp])
        i_g = sig[:, 0 * Hp:1 * Hp]
        f_g = sig[:, 1 * Hp:2 * Hp]
        o_g = sig[:, 2 * Hp:3 * Hp]
        g_g = jnp.tanh(gates[:, 3 * Hp:4 * Hp])
        c = f_g * c + i_g * g_g
        h = o_g * jnp.tanh(c)
        # Padded lanes: gates==0 -> i=f=o=0.5, g=0 -> c = 0.5*0 + 0.5*0 = 0,
        # h = 0.5*tanh(0) = 0, so padding stays exactly zero forever.

    out_ref[...] = (jnp.dot(h, w_out_ref[...],
                            preferred_element_type=jnp.float32)
                    + b_out_ref[...])


def predict_lstm_forward(x_btf, params, *, batch_block=SUBLANE):
    """x_btf: (B, T, F) float32, batch_first like PyTorch."""
    B, T, F = x_btf.shape
    H = params["w_hh"].shape[1]            # w_hh stored as (4H, H)
    Hp = _round_up(H, LANE)                # per-gate slot padded to a full lane width
    Fp = _round_up(F, LANE)                # lane-dense output
    BB = batch_block
    Bp = _round_up(B, BB)

    # Time-major, batch padded to a whole sublane tile (padded rows are
    # independent and sliced off at the end).
    x_tbf = jnp.transpose(x_btf, (1, 0, 2)).astype(jnp.float32)    # (T, B, F)
    x_tbf = jnp.pad(x_tbf, ((0, 0), (0, Bp - B), (0, 0)))          # (T, Bp, F)

    perm = jnp.array(_GATE_PERM)

    def prep_gate_weight(w):
        # w: (4H, cols) -> (cols, 4*Hp), gates reordered [i,f,o,g], each padded to Hp.
        cols = w.shape[1]
        wg = w.reshape(4, H, cols)[perm]                           # (4, H, cols)
        wg = jnp.pad(wg, ((0, 0), (0, Hp - H), (0, 0)))            # (4, Hp, cols)
        return jnp.transpose(wg.reshape(4 * Hp, cols), (1, 0))     # (cols, 4*Hp)

    w_ih_p = prep_gate_weight(params["w_ih"]).astype(jnp.float32)  # (F, 4Hp)
    w_hh_p = prep_gate_weight(params["w_hh"])                      # (H, 4Hp)
    w_hh_p = jnp.pad(w_hh_p, ((0, Hp - H), (0, 0))).astype(jnp.bfloat16)  # (Hp, 4Hp)

    bias = (params["b_ih"] + params["b_hh"]).reshape(4, H)[perm]   # (4, H) reordered
    b_p = jnp.pad(bias, ((0, 0), (0, Hp - H))).reshape(1, 4 * Hp).astype(jnp.float32)

    w_out_p = jnp.pad(params["w_out"].T.astype(jnp.float32),
                      ((0, Hp - H), (0, Fp - F)))                  # (Hp, Fp), zero pad
    b_out_p = jnp.pad(params["b_out"].astype(jnp.float32),
                      ((0, Fp - F),)).reshape(1, Fp)               # (1, Fp)

    grid = (Bp // BB,)
    grid_spec = pltpu.PrefetchScalarGridSpec(
        num_scalar_prefetch=0,
        grid=grid,
        in_specs=[
            pl.BlockSpec((T, BB, F), lambda bi: (0, bi, 0)),
            pl.BlockSpec((F, 4 * Hp), lambda bi: (0, 0)),
            pl.BlockSpec((Hp, 4 * Hp), lambda bi: (0, 0)),
            pl.BlockSpec((1, 4 * Hp), lambda bi: (0, 0)),
            pl.BlockSpec((Hp, Fp), lambda bi: (0, 0)),
            pl.BlockSpec((1, Fp), lambda bi: (0, 0)),
        ],
        out_specs=pl.BlockSpec((BB, Fp), lambda bi: (bi, 0)),
        scratch_shapes=[pltpu.VMEM((T, BB, 4 * Hp), jnp.float32)],
    )

    out_p = pl.pallas_call(
        lstm_last_linear_kernel,
        out_shape=jax.ShapeDtypeStruct((Bp, Fp), jnp.float32),
        grid_spec=grid_spec,
        compiler_params=pltpu.CompilerParams(
            dimension_semantics=("parallel",)),
    )(x_tbf, w_ih_p, w_hh_p, b_p, w_out_p, b_out_p)

    return out_p[:B, :F]


def init_params(key, n_features=12, embedding_dim=3):
    """Deterministic init mimicking PyTorch's uniform(-1/sqrt(H), 1/sqrt(H))."""
    H = embedding_dim * n_features
    F = n_features
    k = 1.0 / np.sqrt(H)
    keys = jax.random.split(key, 6)
    u = lambda kk, shape: jax.random.uniform(kk, shape, jnp.float32, -k, k)
    return {
        "w_ih": u(keys[0], (4 * H, F)),
        "w_hh": u(keys[1], (4 * H, H)),
        "b_ih": u(keys[2], (4 * H,)),
        "b_hh": u(keys[3], (4 * H,)),
        "w_out": u(keys[4], (F, H)),
        "b_out": u(keys[5], (F,)),
    }


def reference_forward(x_btf, params):
    """Pure-JAX f32 reference of the PyTorch forward for correctness checking."""
    B, T, F = x_btf.shape
    H = params["w_hh"].shape[1]
    h = jnp.zeros((B, H), jnp.float32)
    c = jnp.zeros((B, H), jnp.float32)
    for t in range(T):
        gates = (x_btf[:, t, :] @ params["w_ih"].T + params["b_ih"]
                 + h @ params["w_hh"].T + params["b_hh"])
        i_g = jax.nn.sigmoid(gates[:, 0 * H:1 * H])
        f_g = jax.nn.sigmoid(gates[:, 1 * H:2 * H])
        g_g = jnp.tanh(gates[:, 2 * H:3 * H])
        o_g = jax.nn.sigmoid(gates[:, 3 * H:4 * H])
        c = f_g * c + i_g * g_g
        h = o_g * jnp.tanh(c)
    return h @ params["w_out"].T + params["b_out"]


if __name__ == "__main__":
    n_features, embedding_dim = 12, 3   # module defaults -> hidden = 36
    B, T = 2, 8

    key = jax.random.PRNGKey(0)
    k_x, k_p = jax.random.split(key)
    x = jax.random.normal(k_x, (B, T, n_features), jnp.float32)
    params = init_params(k_p, n_features, embedding_dim)

    out = predict_lstm_forward(x, params)
    out = jax.block_until_ready(out)

    ref = reference_forward(x, params)
    # bf16 recurrent matmul -> relaxed tolerance vs the f32 reference.
    np.testing.assert_allclose(np.asarray(out), np.asarray(ref),
                               rtol=1e-2, atol=5e-3)

    print("KERNEL_OK")
</pallas_src>

<mosaic_0001>
module attributes {stable_mosaic.version = 11 : i64} {
  func.func @lstm_last_linear_kernel(%arg0: i32, %arg1: memref<8x8x12xf32, #tpu.memory_space<vmem>>, %arg2: memref<12x512xf32, #tpu.memory_space<vmem>>, %arg3: memref<128x512xbf16, #tpu.memory_space<vmem>>, %arg4: memref<1x512xf32, #tpu.memory_space<vmem>>, %arg5: memref<128x128xf32, #tpu.memory_space<vmem>>, %arg6: memref<1x128xf32, #tpu.memory_space<vmem>>, %arg7: memref<8x128xf32, #tpu.memory_space<vmem>>, %arg8: memref<8x8x512xf32, #tpu.memory_space<vmem>>) attributes {dimension_semantics = [#tpu.dimension_semantics<parallel>], iteration_bounds = array<i64: 1>, scalar_prefetch = 0 : i64, scratch_operands = 1 : i64, tpu.core_type = #tpu.core_type<tc>, window_params = [{transform_indices = @transform_0, window_bounds = array<i64: 8, 8, 12>}, {pipeline_mode = #tpu.pipeline_mode<synchronous>, transform_indices = @transform_1, window_bounds = array<i64: 12, 512>}, {pipeline_mode = #tpu.pipeline_mode<synchronous>, transform_indices = @transform_2, window_bounds = array<i64: 128, 512>}, {pipeline_mode = #tpu.pipeline_mode<synchronous>, transform_indices = @transform_3, window_bounds = array<i64: 1, 512>}, {pipeline_mode = #tpu.pipeline_mode<synchronous>, transform_indices = @transform_4, window_bounds = array<i64: 128, 128>}, {pipeline_mode = #tpu.pipeline_mode<synchronous>, transform_indices = @transform_5, window_bounds = array<i64: 1, 128>}, {transform_indices = @transform_6, window_bounds = array<i64: 8, 128>}]} {
    %c0 = arith.constant 0 : index
    %c0_0 = arith.constant 0 : index
    %0 = vector.load %arg2[%c0, %c0_0] : memref<12x512xf32, #tpu.memory_space<vmem>>, vector<12x512xf32>
    %c0_1 = arith.constant 0 : index
    %c0_2 = arith.constant 0 : index
    %1 = vector.load %arg4[%c0_1, %c0_2] : memref<1x512xf32, #tpu.memory_space<vmem>>, vector<1x512xf32>
    %c0_3 = arith.constant 0 : index
    %c0_4 = arith.constant 0 : index
    %c0_5 = arith.constant 0 : index
    %2 = vector.load %arg1[%c0_3, %c0_4, %c0_5] : memref<8x8x12xf32, #tpu.memory_space<vmem>>, vector<1x8x12xf32>
    %3 = vector.shape_cast %2 : vector<1x8x12xf32> to vector<8x12xf32>
    %cst = arith.constant dense<0.000000e+00> : vector<8x512xf32>
    %4 = tpu.matmul %3, %0, %cst {dimension_numbers = #tpu.dot_dimension_numbers<[1], [0], [0], [1], [0, 0, 1, 1], [], []>} : vector<8x12xf32>, vector<12x512xf32>, vector<8x512xf32> -> vector<8x512xf32>
    %5 = vector.broadcast %1 : vector<1x512xf32> to vector<8x512xf32>
    %6 = arith.addf %4, %5 : vector<8x512xf32>
    %c0_6 = arith.constant 0 : index
    %c0_7 = arith.constant 0 : index
    %c0_8 = arith.constant 0 : index
    %7 = vector.load %arg8[%c0_6, %c0_7, %c0_8] : memref<8x8x512xf32, #tpu.memory_space<vmem>>, vector<1x8x512xf32>
    %8 = vector.shape_cast %7 : vector<1x8x512xf32> to vector<8x512xf32>
    %9 = vector.shape_cast %6 : vector<8x512xf32> to vector<1x8x512xf32>
    tpu.vector_store %arg8[%c0_6, %c0_7, %c0_8], %9 {strides = array<i32>} : memref<8x8x512xf32, #tpu.memory_space<vmem>>, vector<1x8x512xf32>,
    %c1 = arith.constant 1 : index
    %c0_9 = arith.constant 0 : index
    %c0_10 = arith.constant 0 : index
    %10 = vector.load %arg1[%c1, %c0_9, %c0_10] : memref<8x8x12xf32, #tpu.memory_space<vmem>>, vector<1x8x12xf32>
    %11 = vector.shape_cast %10 : vector<1x8x12xf32> to vector<8x12xf32>
    %cst_11 = arith.constant dense<0.000000e+00> : vector<8x512xf32>
    %12 = tpu.matmul %11, %0, %cst_11 {dimension_numbers = #tpu.dot_dimension_numbers<[1], [0], [0], [1], [0, 0, 1, 1], [], []>} : vector<8x12xf32>, vector<12x512xf32>, vector<8x512xf32> -> vector<8x512xf32>
    %13 = vector.broadcast %1 : vector<1x512xf32> to vector<8x512xf32>
    %14 = arith.addf %12, %13 : vector<8x512xf32>
    %c1_12 = arith.constant 1 : index
    %c0_13 = arith.constant 0 : index
    %c0_14 = arith.constant 0 : index
    %15 = vector.load %arg8[%c1_12, %c0_13, %c0_14] : memref<8x8x512xf32, #tpu.memory_space<vmem>>, vector<1x8x512xf32>
    %16 = vector.shape_cast %15 : vector<1x8x512xf32> to vector<8x512xf32>
    %17 = vector.shape_cast %14 : vector<8x512xf32> to vector<1x8x512xf32>
    tpu.vector_store %arg8[%c1_12, %c0_13, %c0_14], %17 {strides = array<i32>} : memref<8x8x512xf32, #tpu.memory_space<vmem>>, vector<1x8x512xf32>,
    %c2 = arith.constant 2 : index
    %c0_15 = arith.constant 0 : index
    %c0_16 = arith.constant 0 : index
    %18 = vector.load %arg1[%c2, %c0_15, %c0_16] : memref<8x8x12xf32, #tpu.memory_space<vmem>>, vector<1x8x12xf32>
    %19 = vector.shape_cast %18 : vector<1x8x12xf32> to vector<8x12xf32>
    %cst_17 = arith.constant dense<0.000000e+00> : vector<8x512xf32>
    %20 = tpu.matmul %19, %0, %cst_17 {dimension_numbers = #tpu.dot_dimension_numbers<[1], [0], [0], [1], [0, 0, 1, 1], [], []>} : vector<8x12xf32>, vector<12x512xf32>, vector<8x512xf32> -> vector<8x512xf32>
    %21 = vector.broadcast %1 : vector<1x512xf32> to vector<8x512xf32>
    %22 = arith.addf %20, %21 : vector<8x512xf32>
    %c2_18 = arith.constant 2 : index
    %c0_19 = arith.constant 0 : index
    %c0_20 = arith.constant 0 : index
    %23 = vector.load %arg8[%c2_18, %c0_19, %c0_20] : memref<8x8x512xf32, #tpu.memory_space<vmem>>, vector<1x8x512xf32>
    %24 = vector.shape_cast %23 : vector<1x8x512xf32> to vector<8x512xf32>
    %25 = vector.shape_cast %22 : vector<8x512xf32> to vector<1x8x512xf32>
    tpu.vector_store %arg8[%c2_18, %c0_19, %c0_20], %25 {strides = array<i32>} : memref<8x8x512xf32, #tpu.memory_space<vmem>>, vector<1x8x512xf32>,
    %c3 = arith.constant 3 : index
    %c0_21 = arith.constant 0 : index
    %c0_22 = arith.constant 0 : index
    %26 = vector.load %arg1[%c3, %c0_21, %c0_22] : memref<8x8x12xf32, #tpu.memory_space<vmem>>, vector<1x8x12xf32>
    %27 = vector.shape_cast %26 : vector<1x8x12xf32> to vector<8x12xf32>
    %cst_23 = arith.constant dense<0.000000e+00> : vector<8x512xf32>
    %28 = tpu.matmul %27, %0, %cst_23 {dimension_numbers = #tpu.dot_dimension_numbers<[1], [0], [0], [1], [0, 0, 1, 1], [], []>} : vector<8x12xf32>, vector<12x512xf32>, vector<8x512xf32> -> vector<8x512xf32>
    %29 = vector.broadcast %1 : vector<1x512xf32> to vector<8x512xf32>
    %30 = arith.addf %28, %29 : vector<8x512xf32>
    %c3_24 = arith.constant 3 : index
    %c0_25 = arith.constant 0 : index
    %c0_26 = arith.constant 0 : index
    %31 = vector.load %arg8[%c3_24, %c0_25, %c0_26] : memref<8x8x512xf32, #tpu.memory_space<vmem>>, vector<1x8x512xf32>
    %32 = vector.shape_cast %31 : vector<1x8x512xf32> to vector<8x512xf32>
    %33 = vector.shape_cast %30 : vector<8x512xf32> to vector<1x8x512xf32>
    tpu.vector_store %arg8[%c3_24, %c0_25, %c0_26], %33 {strides = array<i32>} : memref<8x8x512xf32, #tpu.memory_space<vmem>>, vector<1x8x512xf32>,
    %c4 = arith.constant 4 : index
    %c0_27 = arith.constant 0 : index
    %c0_28 = arith.constant 0 : index
    %34 = vector.load %arg1[%c4, %c0_27, %c0_28] : memref<8x8x12xf32, #tpu.memory_space<vmem>>, vector<1x8x12xf32>
    %35 = vector.shape_cast %34 : vector<1x8x12xf32> to vector<8x12xf32>
    %cst_29 = arith.constant dense<0.000000e+00> : vector<8x512xf32>
    %36 = tpu.matmul %35, %0, %cst_29 {dimension_numbers = #tpu.dot_dimension_numbers<[1], [0], [0], [1], [0, 0, 1, 1], [], []>} : vector<8x12xf32>, vector<12x512xf32>, vector<8x512xf32> -> vector<8x512xf32>
    %37 = vector.broadcast %1 : vector<1x512xf32> to vector<8x512xf32>
    %38 = arith.addf %36, %37 : vector<8x512xf32>
    %c4_30 = arith.constant 4 : index
    %c0_31 = arith.constant 0 : index
    %c0_32 = arith.constant 0 : index
    %39 = vector.load %arg8[%c4_30, %c0_31, %c0_32] : memref<8x8x512xf32, #tpu.memory_space<vmem>>, vector<1x8x512xf32>
    %40 = vector.shape_cast %39 : vector<1x8x512xf32> to vector<8x512xf32>
    %41 = vector.shape_cast %38 : vector<8x512xf32> to vector<1x8x512xf32>
    tpu.vector_store %arg8[%c4_30, %c0_31, %c0_32], %41 {strides = array<i32>} : memref<8x8x512xf32, #tpu.memory_space<vmem>>, vector<1x8x512xf32>,
    %c5 = arith.constant 5 : index
    %c0_33 = arith.constant 0 : index
    %c0_34 = arith.constant 0 : index
    %42 = vector.load %arg1[%c5, %c0_33, %c0_34] : memref<8x8x12xf32, #tpu.memory_space<vmem>>, vector<1x8x12xf32>
    %43 = vector.shape_cast %42 : vector<1x8x12xf32> to vector<8x12xf32>
    %cst_35 = arith.constant dense<0.000000e+00> : vector<8x512xf32>
    %44 = tpu.matmul %43, %0, %cst_35 {dimension_numbers = #tpu.dot_dimension_numbers<[1], [0], [0], [1], [0, 0, 1, 1], [], []>} : vector<8x12xf32>, vector<12x512xf32>, vector<8x512xf32> -> vector<8x512xf32>
    %45 = vector.broadcast %1 : vector<1x512xf32> to vector<8x512xf32>
    %46 = arith.addf %44, %45 : vector<8x512xf32>
    %c5_36 = arith.constant 5 : index
    %c0_37 = arith.constant 0 : index
    %c0_38 = arith.constant 0 : index
    %47 = vector.load %arg8[%c5_36, %c0_37, %c0_38] : memref<8x8x512xf32, #tpu.memory_space<vmem>>, vector<1x8x512xf32>
    %48 = vector.shape_cast %47 : vector<1x8x512xf32> to vector<8x512xf32>
    %49 = vector.shape_cast %46 : vector<8x512xf32> to vector<1x8x512xf32>
    tpu.vector_store %arg8[%c5_36, %c0_37, %c0_38], %49 {strides = array<i32>} : memref<8x8x512xf32, #tpu.memory_space<vmem>>, vector<1x8x512xf32>,
    %c6 = arith.constant 6 : index
    %c0_39 = arith.constant 0 : index
    %c0_40 = arith.constant 0 : index
    %50 = vector.load %arg1[%c6, %c0_39, %c0_40] : memref<8x8x12xf32, #tpu.memory_space<vmem>>, vector<1x8x12xf32>
    %51 = vector.shape_cast %50 : vector<1x8x12xf32> to vector<8x12xf32>
    %cst_41 = arith.constant dense<0.000000e+00> : vector<8x512xf32>
    %52 = tpu.matmul %51, %0, %cst_41 {dimension_numbers = #tpu.dot_dimension_numbers<[1], [0], [0], [1], [0, 0, 1, 1], [], []>} : vector<8x12xf32>, vector<12x512xf32>, vector<8x512xf32> -> vector<8x512xf32>
    %53 = vector.broadcast %1 : vector<1x512xf32> to vector<8x512xf32>
    %54 = arith.addf %52, %53 : vector<8x512xf32>
    %c6_42 = arith.constant 6 : index
    %c0_43 = arith.constant 0 : index
    %c0_44 = arith.constant 0 : index
    %55 = vector.load %arg8[%c6_42, %c0_43, %c0_44] : memref<8x8x512xf32, #tpu.memory_space<vmem>>, vector<1x8x512xf32>
    %56 = vector.shape_cast %55 : vector<1x8x512xf32> to vector<8x512xf32>
    %57 = vector.shape_cast %54 : vector<8x512xf32> to vector<1x8x512xf32>
    tpu.vector_store %arg8[%c6_42, %c0_43, %c0_44], %57 {strides = array<i32>} : memref<8x8x512xf32, #tpu.memory_space<vmem>>, vector<1x8x512xf32>,
    %c7 = arith.constant 7 : index
    %c0_45 = arith.constant 0 : index
    %c0_46 = arith.constant 0 : index
    %58 = vector.load %arg1[%c7, %c0_45, %c0_46] : memref<8x8x12xf32, #tpu.memory_space<vmem>>, vector<1x8x12xf32>
    %59 = vector.shape_cast %58 : vector<1x8x12xf32> to vector<8x12xf32>
    %cst_47 = arith.constant dense<0.000000e+00> : vector<8x512xf32>
    %60 = tpu.matmul %59, %0, %cst_47 {dimension_numbers = #tpu.dot_dimension_numbers<[1], [0], [0], [1], [0, 0, 1, 1], [], []>} : vector<8x12xf32>, vector<12x512xf32>, vector<8x512xf32> -> vector<8x512xf32>
    %61 = vector.broadcast %1 : vector<1x512xf32> to vector<8x512xf32>
    %62 = arith.addf %60, %61 : vector<8x512xf32>
    %c7_48 = arith.constant 7 : index
    %c0_49 = arith.constant 0 : index
    %c0_50 = arith.constant 0 : index
    %63 = vector.load %arg8[%c7_48, %c0_49, %c0_50] : memref<8x8x512xf32, #tpu.memory_space<vmem>>, vector<1x8x512xf32>
    %64 = vector.shape_cast %63 : vector<1x8x512xf32> to vector<8x512xf32>
    %65 = vector.shape_cast %62 : vector<8x512xf32> to vector<1x8x512xf32>
    tpu.vector_store %arg8[%c7_48, %c0_49, %c0_50], %65 {strides = array<i32>} : memref<8x8x512xf32, #tpu.memory_space<vmem>>, vector<1x8x512xf32>,
    %c0_51 = arith.constant 0 : index
    %c0_52 = arith.constant 0 : index
    %66 = vector.load %arg3[%c0_51, %c0_52] : memref<128x512xbf16, #tpu.memory_space<vmem>>, vector<128x512xbf16>
    %cst_53 = arith.constant 0.000000e+00 : f32
    %67 = vector.broadcast %cst_53 : f32 to vector<8x128xf32>
    %cst_54 = arith.constant 0.000000e+00 : f32
    %68 = vector.broadcast %cst_54 : f32 to vector<8x128xf32>
    %c0_55 = arith.constant 0 : index
    %c0_56 = arith.constant 0 : index
    %c0_57 = arith.constant 0 : index
    %69 = vector.load %arg8[%c0_55, %c0_56, %c0_57] : memref<8x8x512xf32, #tpu.memory_space<vmem>>, vector<1x8x512xf32>
    %70 = vector.shape_cast %69 : vector<1x8x512xf32> to vector<8x512xf32>
    %71 = arith.truncf %67 : vector<8x128xf32> to vector<8x128xbf16>
    %cst_58 = arith.constant dense<0.000000e+00> : vector<8x512xf32>
    %72 = tpu.matmul %71, %66, %cst_58 {dimension_numbers = #tpu.dot_dimension_numbers<[1], [0], [0], [1], [0, 0, 1, 1], [], []>} : vector<8x128xbf16>, vector<128x512xbf16>, vector<8x512xf32> -> vector<8x512xf32>
    %73 = arith.addf %70, %72 : vector<8x512xf32>
    %74 = vector.extract_strided_slice %73 {offsets = [0, 0], sizes = [8, 384], strides = [1, 1]} : vector<8x512xf32> to vector<8x384xf32>
    %75 = arith.negf %74 : vector<8x384xf32>
    %76 = math.exp %75 : vector<8x384xf32>
    %cst_59 = arith.constant 1.000000e+00 : f32
    %77 = vector.broadcast %cst_59 : f32 to vector<8x384xf32>
    %78 = arith.addf %77, %76 : vector<8x384xf32>
    %79 = arith.divf %77, %78 : vector<8x384xf32>
    %80 = vector.extract_strided_slice %79 {offsets = [0, 0], sizes = [8, 128], strides = [1, 1]} : vector<8x384xf32> to vector<8x128xf32>
    %81 = vector.extract_strided_slice %79 {offsets = [0, 128], sizes = [8, 128], strides = [1, 1]} : vector<8x384xf32> to vector<8x128xf32>
    %82 = vector.extract_strided_slice %79 {offsets = [0, 256], sizes = [8, 128], strides = [1, 1]} : vector<8x384xf32> to vector<8x128xf32>
    %83 = vector.extract_strided_slice %73 {offsets = [0, 384], sizes = [8, 128], strides = [1, 1]} : vector<8x512xf32> to vector<8x128xf32>
    %84 = math.tanh %83 : vector<8x128xf32>
    %85 = arith.mulf %81, %68 : vector<8x128xf32>
    %86 = arith.mulf %80, %84 : vector<8x128xf32>
    %87 = arith.addf %85, %86 : vector<8x128xf32>
    %88 = math.tanh %87 : vector<8x128xf32>
    %89 = arith.mulf %82, %88 : vector<8x128xf32>
    %c1_60 = arith.constant 1 : index
    %c0_61 = arith.constant 0 : index
    %c0_62 = arith.constant 0 : index
    %90 = vector.load %arg8[%c1_60, %c0_61, %c0_62] : memref<8x8x512xf32, #tpu.memory_space<vmem>>, vector<1x8x512xf32>
    %91 = vector.shape_cast %90 : vector<1x8x512xf32> to vector<8x512xf32>
    %92 = arith.truncf %89 : vector<8x128xf32> to vector<8x128xbf16>
    %cst_63 = arith.constant dense<0.000000e+00> : vector<8x512xf32>
    %93 = tpu.matmul %92, %66, %cst_63 {dimension_numbers = #tpu.dot_dimension_numbers<[1], [0], [0], [1], [0, 0, 1, 1], [], []>} : vector<8x128xbf16>, vector<128x512xbf16>, vector<8x512xf32> -> vector<8x512xf32>
    %94 = arith.addf %91, %93 : vector<8x512xf32>
    %95 = vector.extract_strided_slice %94 {offsets = [0, 0], sizes = [8, 384], strides = [1, 1]} : vector<8x512xf32> to vector<8x384xf32>
    %96 = arith.negf %95 : vector<8x384xf32>
    %97 = math.exp %96 : vector<8x384xf32>
    %cst_64 = arith.constant 1.000000e+00 : f32
    %98 = vector.broadcast %cst_64 : f32 to vector<8x384xf32>
    %99 = arith.addf %98, %97 : vector<8x384xf32>
    %100 = arith.divf %98, %99 : vector<8x384xf32>
    %101 = vector.extract_strided_slice %100 {offsets = [0, 0], sizes = [8, 128], strides = [1, 1]} : vector<8x384xf32> to vector<8x128xf32>
    %102 = vector.extract_strided_slice %100 {offsets = [0, 128], sizes = [8, 128], strides = [1, 1]} : vector<8x384xf32> to vector<8x128xf32>
    %103 = vector.extract_strided_slice %100 {offsets = [0, 256], sizes = [8, 128], strides = [1, 1]} : vector<8x384xf32> to vector<8x128xf32>
    %104 = vector.extract_strided_slice %94 {offsets = [0, 384], sizes = [8, 128], strides = [1, 1]} : vector<8x512xf32> to vector<8x128xf32>
    %105 = math.tanh %104 : vector<8x128xf32>
    %106 = arith.mulf %102, %87 : vector<8x128xf32>
    %107 = arith.mulf %101, %105 : vector<8x128xf32>
    %108 = arith.addf %106, %107 : vector<8x128xf32>
    %109 = math.tanh %108 : vector<8x128xf32>
    %110 = arith.mulf %103, %109 : vector<8x128xf32>
    %c2_65 = arith.constant 2 : index
    %c0_66 = arith.constant 0 : index
    %c0_67 = arith.constant 0 : index
    %111 = vector.load %arg8[%c2_65, %c0_66, %c0_67] : memref<8x8x512xf32, #tpu.memory_space<vmem>>, vector<1x8x512xf32>
    %112 = vector.shape_cast %111 : vector<1x8x512xf32> to vector<8x512xf32>
    %113 = arith.truncf %110 : vector<8x128xf32> to vector<8x128xbf16>
    %cst_68 = arith.constant dense<0.000000e+00> : vector<8x512xf32>
    %114 = tpu.matmul %113, %66, %cst_68 {dimension_numbers = #tpu.dot_dimension_numbers<[1], [0], [0], [1], [0, 0, 1, 1], [], []>} : vector<8x128xbf16>, vector<128x512xbf16>, vector<8x512xf32> -> vector<8x512xf32>
    %115 = arith.addf %112, %114 : vector<8x512xf32>
    %116 = vector.extract_strided_slice %115 {offsets = [0, 0], sizes = [8, 384], strides = [1, 1]} : vector<8x512xf32> to vector<8x384xf32>
    %117 = arith.negf %116 : vector<8x384xf32>
    %118 = math.exp %117 : vector<8x384xf32>
    %cst_69 = arith.constant 1.000000e+00 : f32
    %119 = vector.broadcast %cst_69 : f32 to vector<8x384xf32>
    %120 = arith.addf %119, %118 : vector<8x384xf32>
    %121 = arith.divf %119, %120 : vector<8x384xf32>
    %122 = vector.extract_strided_slice %121 {offsets = [0, 0], sizes = [8, 128], strides = [1, 1]} : vector<8x384xf32> to vector<8x128xf32>
    %123 = vector.extract_strided_slice %121 {offsets = [0, 128], sizes = [8, 128], strides = [1, 1]} : vector<8x384xf32> to vector<8x128xf32>
    %124 = vector.extract_strided_slice %121 {offsets = [0, 256], sizes = [8, 128], strides = [1, 1]} : vector<8x384xf32> to vector<8x128xf32>
    %125 = vector.extract_strided_slice %115 {offsets = [0, 384], sizes = [8, 128], strides = [1, 1]} : vector<8x512xf32> to vector<8x128xf32>
    %126 = math.tanh %125 : vector<8x128xf32>
    %127 = arith.mulf %123, %108 : vector<8x128xf32>
    %128 = arith.mulf %122, %126 : vector<8x128xf32>
    %129 = arith.addf %127, %128 : vector<8x128xf32>
    %130 = math.tanh %129 : vector<8x128xf32>
    %131 = arith.mulf %124, %130 : vector<8x128xf32>
    %c3_70 = arith.constant 3 : index
    %c0_71 = arith.constant 0 : index
    %c0_72 = arith.constant 0 : index
    %132 = vector.load %arg8[%c3_70, %c0_71, %c0_72] : memref<8x8x512xf32, #tpu.memory_space<vmem>>, vector<1x8x512xf32>
    %133 = vector.shape_cast %132 : vector<1x8x512xf32> to vector<8x512xf32>
    %134 = arith.truncf %131 : vector<8x128xf32> to vector<8x128xbf16>
    %cst_73 = arith.constant dense<0.000000e+00> : vector<8x512xf32>
    %135 = tpu.matmul %134, %66, %cst_73 {dimension_numbers = #tpu.dot_dimension_numbers<[1], [0], [0], [1], [0, 0, 1, 1], [], []>} : vector<8x128xbf16>, vector<128x512xbf16>, vector<8x512xf32> -> vector<8x512xf32>
    %136 = arith.addf %133, %135 : vector<8x512xf32>
    %137 = vector.extract_strided_slice %136 {offsets = [0, 0], sizes = [8, 384], strides = [1, 1]} : vector<8x512xf32> to vector<8x384xf32>
    %138 = arith.negf %137 : vector<8x384xf32>
    %139 = math.exp %138 : vector<8x384xf32>
    %cst_74 = arith.constant 1.000000e+00 : f32
    %140 = vector.broadcast %cst_74 : f32 to vector<8x384xf32>
    %141 = arith.addf %140, %139 : vector<8x384xf32>
    %142 = arith.divf %140, %141 : vector<8x384xf32>
    %143 = vector.extract_strided_slice %142 {offsets = [0, 0], sizes = [8, 128], strides = [1, 1]} : vector<8x384xf32> to vector<8x128xf32>
    %144 = vector.extract_strided_slice %142 {offsets = [0, 128], sizes = [8, 128], strides = [1, 1]} : vector<8x384xf32> to vector<8x128xf32>
    %145 = vector.extract_strided_slice %142 {offsets = [0, 256], sizes = [8, 128], strides = [1, 1]} : vector<8x384xf32> to vector<8x128xf32>
    %146 = vector.extract_strided_slice %136 {offsets = [0, 384], sizes = [8, 128], strides = [1, 1]} : vector<8x512xf32> to vector<8x128xf32>
    %147 = math.tanh %146 : vector<8x128xf32>
    %148 = arith.mulf %144, %129 : vector<8x128xf32>
    %149 = arith.mulf %143, %147 : vector<8x128xf32>
    %150 = arith.addf %148, %149 : vector<8x128xf32>
    %151 = math.tanh %150 : vector<8x128xf32>
    %152 = arith.mulf %145, %151 : vector<8x128xf32>
    %c4_75 = arith.constant 4 : index
    %c0_76 = arith.constant 0 : index
    %c0_77 = arith.constant 0 : index
    %153 = vector.load %arg8[%c4_75, %c0_76, %c0_77] : memref<8x8x512xf32, #tpu.memory_space<vmem>>, vector<1x8x512xf32>
    %154 = vector.shape_cast %153 : vector<1x8x512xf32> to vector<8x512xf32>
    %155 = arith.truncf %152 : vector<8x128xf32> to vector<8x128xbf16>
    %cst_78 = arith.constant dense<0.000000e+00> : vector<8x512xf32>
    %156 = tpu.matmul %155, %66, %cst_78 {dimension_numbers = #tpu.dot_dimension_numbers<[1], [0], [0], [1], [0, 0, 1, 1], [], []>} : vector<8x128xbf16>, vector<128x512xbf16>, vector<8x512xf32> -> vector<8x512xf32>
    %157 = arith.addf %154, %156 : vector<8x512xf32>
    %158 = vector.extract_strided_slice %157 {offsets = [0, 0], sizes = [8, 384], strides = [1, 1]} : vector<8x512xf32> to vector<8x384xf32>
    %159 = arith.negf %158 : vector<8x384xf32>
    %160 = math.exp %159 : vector<8x384xf32>
    %cst_79 = arith.constant 1.000000e+00 : f32
    %161 = vector.broadcast %cst_79 : f32 to vector<8x384xf32>
    %162 = arith.addf %161, %160 : vector<8x384xf32>
    %163 = arith.divf %161, %162 : vector<8x384xf32>
    %164 = vector.extract_strided_slice %163 {offsets = [0, 0], sizes = [8, 128], strides = [1, 1]} : vector<8x384xf32> to vector<8x128xf32>
    %165 = vector.extract_strided_slice %163 {offsets = [0, 128], sizes = [8, 128], strides = [1, 1]} : vector<8x384xf32> to vector<8x128xf32>
    %166 = vector.extract_strided_slice %163 {offsets = [0, 256], sizes = [8, 128], strides = [1, 1]} : vector<8x384xf32> to vector<8x128xf32>
    %167 = vector.extract_strided_slice %157 {offsets = [0, 384], sizes = [8, 128], strides = [1, 1]} : vector<8x512xf32> to vector<8x128xf32>
    %168 = math.tanh %167 : vector<8x128xf32>
    %169 = arith.mulf %165, %150 : vector<8x128xf32>
    %170 = arith.mulf %164, %168 : vector<8x128xf32>
    %171 = arith.addf %169, %170 : vector<8x128xf32>
    %172 = math.tanh %171 : vector<8x128xf32>
    %173 = arith.mulf %166, %172 : vector<8x128xf32>
    %c5_80 = arith.constant 5 : index
    %c0_81 = arith.constant 0 : index
    %c0_82 = arith.constant 0 : index
    %174 = vector.load %arg8[%c5_80, %c0_81, %c0_82] : memref<8x8x512xf32, #tpu.memory_space<vmem>>, vector<1x8x512xf32>
    %175 = vector.shape_cast %174 : vector<1x8x512xf32> to vector<8x512xf32>
    %176 = arith.truncf %173 : vector<8x128xf32> to vector<8x128xbf16>
    %cst_83 = arith.constant dense<0.000000e+00> : vector<8x512xf32>
    %177 = tpu.matmul %176, %66, %cst_83 {dimension_numbers = #tpu.dot_dimension_numbers<[1], [0], [0], [1], [0, 0, 1, 1], [], []>} : vector<8x128xbf16>, vector<128x512xbf16>, vector<8x512xf32> -> vector<8x512xf32>
    %178 = arith.addf %175, %177 : vector<8x512xf32>
    %179 = vector.extract_strided_slice %178 {offsets = [0, 0], sizes = [8, 384], strides = [1, 1]} : vector<8x512xf32> to vector<8x384xf32>
    %180 = arith.negf %179 : vector<8x384xf32>
    %181 = math.exp %180 : vector<8x384xf32>
    %cst_84 = arith.constant 1.000000e+00 : f32
    %182 = vector.broadcast %cst_84 : f32 to vector<8x384xf32>
    %183 = arith.addf %182, %181 : vector<8x384xf32>
    %184 = arith.divf %182, %183 : vector<8x384xf32>
    %185 = vector.extract_strided_slice %184 {offsets = [0, 0], sizes = [8, 128], strides = [1, 1]} : vector<8x384xf32> to vector<8x128xf32>
    %186 = vector.extract_strided_slice %184 {offsets = [0, 128], sizes = [8, 128], strides = [1, 1]} : vector<8x384xf32> to vector<8x128xf32>
    %187 = vector.extract_strided_slice %184 {offsets = [0, 256], sizes = [8, 128], strides = [1, 1]} : vector<8x384xf32> to vector<8x128xf32>
    %188 = vector.extract_strided_slice %178 {offsets = [0, 384], sizes = [8, 128], strides = [1, 1]} : vector<8x512xf32> to vector<8x128xf32>
    %189 = math.tanh %188 : vector<8x128xf32>
    %190 = arith.mulf %186, %171 : vector<8x128xf32>
    %191 = arith.mulf %185, %189 : vector<8x128xf32>
    %192 = arith.addf %190, %191 : vector<8x128xf32>
    %193 = math.tanh %192 : vector<8x128xf32>
    %194 = arith.mulf %187, %193 : vector<8x128xf32>
    %c6_85 = arith.constant 6 : index
    %c0_86 = arith.constant 0 : index
    %c0_87 = arith.constant 0 : index
    %195 = vector.load %arg8[%c6_85, %c0_86, %c0_87] : memref<8x8x512xf32, #tpu.memory_space<vmem>>, vector<1x8x512xf32>
    %196 = vector.shape_cast %195 : vector<1x8x512xf32> to vector<8x512xf32>
    %197 = arith.truncf %194 : vector<8x128xf32> to vector<8x128xbf16>
    %cst_88 = arith.constant dense<0.000000e+00> : vector<8x512xf32>
    %198 = tpu.matmul %197, %66, %cst_88 {dimension_numbers = #tpu.dot_dimension_numbers<[1], [0], [0], [1], [0, 0, 1, 1], [], []>} : vector<8x128xbf16>, vector<128x512xbf16>, vector<8x512xf32> -> vector<8x512xf32>
    %199 = arith.addf %196, %198 : vector<8x512xf32>
    %200 = vector.extract_strided_slice %199 {offsets = [0, 0], sizes = [8, 384], strides = [1, 1]} : vector<8x512xf32> to vector<8x384xf32>
    %201 = arith.negf %200 : vector<8x384xf32>
    %202 = math.exp %201 : vector<8x384xf32>
    %cst_89 = arith.constant 1.000000e+00 : f32
    %203 = vector.broadcast %cst_89 : f32 to vector<8x384xf32>
    %204 = arith.addf %203, %202 : vector<8x384xf32>
    %205 = arith.divf %203, %204 : vector<8x384xf32>
    %206 = vector.extract_strided_slice %205 {offsets = [0, 0], sizes = [8, 128], strides = [1, 1]} : vector<8x384xf32> to vector<8x128xf32>
    %207 = vector.extract_strided_slice %205 {offsets = [0, 128], sizes = [8, 128], strides = [1, 1]} : vector<8x384xf32> to vector<8x128xf32>
    %208 = vector.extract_strided_slice %205 {offsets = [0, 256], sizes = [8, 128], strides = [1, 1]} : vector<8x384xf32> to vector<8x128xf32>
    %209 = vector.extract_strided_slice %199 {offsets = [0, 384], sizes = [8, 128], strides = [1, 1]} : vector<8x512xf32> to vector<8x128xf32>
    %210 = math.tanh %209 : vector<8x128xf32>
    %211 = arith.mulf %207, %192 : vector<8x128xf32>
    %212 = arith.mulf %206, %210 : vector<8x128xf32>
    %213 = arith.addf %211, %212 : vector<8x128xf32>
    %214 = math.tanh %213 : vector<8x128xf32>
    %215 = arith.mulf %208, %214 : vector<8x128xf32>
    %c7_90 = arith.constant 7 : index
    %c0_91 = arith.constant 0 : index
    %c0_92 = arith.constant 0 : index
    %216 = vector.load %arg8[%c7_90, %c0_91, %c0_92] : memref<8x8x512xf32, #tpu.memory_space<vmem>>, vector<1x8x512xf32>
    %217 = vector.shape_cast %216 : vector<1x8x512xf32> to vector<8x512xf32>
    %218 = arith.truncf %215 : vector<8x128xf32> to vector<8x128xbf16>
    %cst_93 = arith.constant dense<0.000000e+00> : vector<8x512xf32>
    %219 = tpu.matmul %218, %66, %cst_93 {dimension_numbers = #tpu.dot_dimension_numbers<[1], [0], [0], [1], [0, 0, 1, 1], [], []>} : vector<8x128xbf16>, vector<128x512xbf16>, vector<8x512xf32> -> vector<8x512xf32>
    %220 = arith.addf %217, %219 : vector<8x512xf32>
    %221 = vector.extract_strided_slice %220 {offsets = [0, 0], sizes = [8, 384], strides = [1, 1]} : vector<8x512xf32> to vector<8x384xf32>
    %222 = arith.negf %221 : vector<8x384xf32>
    %223 = math.exp %222 : vector<8x384xf32>
    %cst_94 = arith.constant 1.000000e+00 : f32
    %224 = vector.broadcast %cst_94 : f32 to vector<8x384xf32>
    %225 = arith.addf %224, %223 : vector<8x384xf32>
    %226 = arith.divf %224, %225 : vector<8x384xf32>
    %227 = vector.extract_strided_slice %226 {offsets = [0, 0], sizes = [8, 128], strides = [1, 1]} : vector<8x384xf32> to vector<8x128xf32>
    %228 = vector.extract_strided_slice %226 {offsets = [0, 128], sizes = [8, 128], strides = [1, 1]} : vector<8x384xf32> to vector<8x128xf32>
    %229 = vector.extract_strided_slice %226 {offsets = [0, 256], sizes = [8, 128], strides = [1, 1]} : vector<8x384xf32> to vector<8x128xf32>
    %230 = vector.extract_strided_slice %220 {offsets = [0, 384], sizes = [8, 128], strides = [1, 1]} : vector<8x512xf32> to vector<8x128xf32>
    %231 = math.tanh %230 : vector<8x128xf32>
    %232 = arith.mulf %228, %213 : vector<8x128xf32>
    %233 = arith.mulf %227, %231 : vector<8x128xf32>
    %234 = arith.addf %232, %233 : vector<8x128xf32>
    %235 = math.tanh %234 : vector<8x128xf32>
    %236 = arith.mulf %229, %235 : vector<8x128xf32>
    %c0_95 = arith.constant 0 : index
    %c0_96 = arith.constant 0 : index
    %237 = vector.load %arg5[%c0_95, %c0_96] : memref<128x128xf32, #tpu.memory_space<vmem>>, vector<128x128xf32>
    %cst_97 = arith.constant dense<0.000000e+00> : vector<8x128xf32>
    %238 = tpu.matmul %236, %237, %cst_97 {dimension_numbers = #tpu.dot_dimension_numbers<[1], [0], [0], [1], [0, 0, 1, 1], [], []>} : vector<8x128xf32>, vector<128x128xf32>, vector<8x128xf32> -> vector<8x128xf32>
    %c0_98 = arith.constant 0 : index
    %c0_99 = arith.constant 0 : index
    %239 = vector.load %arg6[%c0_98, %c0_99] : memref<1x128xf32, #tpu.memory_space<vmem>>, vector<1x128xf32>
    %240 = vector.broadcast %239 : vector<1x128xf32> to vector<8x128xf32>
    %241 = arith.addf %238, %240 : vector<8x128xf32>
    %c0_100 = arith.constant 0 : index
    %c0_101 = arith.constant 0 : index
    %242 = vector.load %arg7[%c0_100, %c0_101] : memref<8x128xf32, #tpu.memory_space<vmem>>, vector<8x128xf32>
    tpu.vector_store %arg7[%c0_100, %c0_101], %241 {strides = array<i32>} : memref<8x128xf32, #tpu.memory_space<vmem>>, vector<8x128xf32>,
    return
  }
  func.func @transform_0(%arg0: i32) -> (i32, i32, i32) {
    %c0_i32 = arith.constant 0 : i32
    %c0_i32_0 = arith.constant 0 : i32
    %c0_i32_1 = arith.constant 0 : i32
    return %c0_i32, %arg0, %c0_i32_0 : i32, i32, i32
  }
  func.func @transform_1(%arg0: i32) -> (i32, i32) {
    %c0_i32 = arith.constant 0 : i32
    %c0_i32_0 = arith.constant 0 : i32
    %c0_i32_1 = arith.constant 0 : i32
    return %c0_i32, %c0_i32_0 : i32, i32
  }
  func.func @transform_2(%arg0: i32) -> (i32, i32) {
    %c0_i32 = arith.constant 0 : i32
    %c0_i32_0 = arith.constant 0 : i32
    %c0_i32_1 = arith.constant 0 : i32
    return %c0_i32, %c0_i32_0 : i32, i32
  }
  func.func @transform_3(%arg0: i32) -> (i32, i32) {
    %c0_i32 = arith.constant 0 : i32
    %c0_i32_0 = arith.constant 0 : i32
    %c0_i32_1 = arith.constant 0 : i32
    return %c0_i32, %c0_i32_0 : i32, i32
  }
  func.func @transform_4(%arg0: i32) -> (i32, i32) {
    %c0_i32 = arith.constant 0 : i32
    %c0_i32_0 = arith.constant 0 : i32
    %c0_i32_1 = arith.constant 0 : i32
    return %c0_i32, %c0_i32_0 : i32, i32
  }
  func.func @transform_5(%arg0: i32) -> (i32, i32) {
    %c0_i32 = arith.constant 0 : i32
    %c0_i32_0 = arith.constant 0 : i32
    %c0_i32_1 = arith.constant 0 : i32
    return %c0_i32, %c0_i32_0 : i32, i32
  }
  func.func @transform_6(%arg0: i32) -> (i32, i32) {
    %c0_i32 = arith.constant 0 : i32
    %c0_i32_0 = arith.constant 0 : i32
    return %arg0, %c0_i32 : i32, i32
  }
}

</mosaic_0001>

<bundles_post_ra>
// kernel: tpu_custom_call.1
= control target key start
LH: loop header
LB: loop body
LE: loop exit
PB: predicated region body
PF: predicated region fallthrough
CT: control target
= control target key end

     0   :  { %11 = vsyncpa [#allocation4], 0  ;;  %s3933_s0 = inlined_call_operand.hbm [shape: f32[8,8,12], index: 0, kind: input, shape index: {}]   ;;  %s3934_s1 = inlined_call_operand.hbm [shape: f32[12,512], index: 1, kind: input, shape index: {}]   ;;  %s3935_s2 = inlined_call_operand.hbm [shape: bf16[128,512], index: 2, kind: input, shape index: {}]   ;;  %s3936_s3 = inlined_call_operand.vmem [shape: f32[1,512], index: 3, kind: input, shape index: {}]   ;;  %s3937_s4 = inlined_call_operand.hbm [shape: f32[128,128], index: 4, kind: input, shape index: {}]   ;;  %s3938_s5 = inlined_call_operand.vmem [shape: f32[1,128], index: 5, kind: input, shape index: {}]   ;;  %s3939_s6 = inlined_call_operand.hbm [shape: f32[8,128], index: 6, kind: output, shape index: {}]  }
   0x1   :  { %12 = vsyncpa [#allocation7], 0 }
   0x2   :  { %13 = vsyncpa [#allocation10], 0 }
   0x3   :  { %14 = vsyncpa [#allocation5], 0  ;;  %s3179_s21 = smov [#allocation6]   ;;  %s3061_s25 = scalar_lea.hbm %s3934_s1, 1024 }
   0x4   :  { %s32_s22 = sshll.u32 %s3179_s21, 4  ;;  %p3062_p0 = scmp.ne.s32.totalorder %s3934_s1, %s3061_s25  ;;  %s33_s22 = int_to_ptr.vmem [resolvable:$true] %s32_s22 }
   0x5   :  { %p3065_p1 = scmp.lt.u32.totalorder %s3061_s25, %s3934_s1 }
   0x7   :  { %p3067_p2 = pnand %p3065_p1, %p3062_p0 }
   0x9   :  { %3070 = shalt.err (!%p3067_p2)
}
   0xa   :  { %s3071_s30 = scalar_lea.vmem %s33_s22, 1024  ;;  %p3076_p4 = scmp.lt.s32.totalorder %s33_s22, %s33_s22 }
   0xb   :  { %p3072_p3 = scmp.ne.s32.totalorder %s33_s22, %s3071_s30  ;;  %p3077_p5 = scmp.lt.s32.totalorder %s3071_s30, %s3071_s30 }
   0xd   :  { %p3078_p6 = por %p3077_p5, %p3076_p4 }
   0xf   :  { %p3079_p7 = pnand %p3078_p6, %p3072_p3 }
  0x11   :  { %3082 = shalt.err (!%p3079_p7)
}
  0x12   :  { %s3180_s7 = smov 512   ;;  %s3181_s8 = smov 32  }
  0x13   :  { %38 = dma.hbm_to_vmem [thread:$0]  %s3934_s1, 1024, %s33_s22, [#allocation7], %s3180_s7, %s3180_s7, %s3181_s8  }
  0x14   :  { %s3182_s11 = smov [#allocation3]   ;;  %s3083_s15 = scalar_lea.hbm %s3933_s0, 1024 }
  0x15   :  { %s20_s12 = sshll.u32 %s3182_s11, 4  ;;  %p3084_p8 = scmp.ne.s32.totalorder %s3933_s0, %s3083_s15  ;;  %s21_s12 = int_to_ptr.vmem [resolvable:$true] %s20_s12 }
  0x16   :  { %p3087_p9 = scmp.lt.u32.totalorder %s3083_s15, %s3933_s0 }
  0x18   :  { %p3089_p10 = pnand %p3087_p9, %p3084_p8 }
  0x1a   :  { %3092 = shalt.err (!%p3089_p10)
}
  0x1b   :  { %s3093_s20 = scalar_lea.vmem %s21_s12, 1024  ;;  %p3098_p12 = scmp.lt.s32.totalorder %s21_s12, %s21_s12 }
  0x1c   :  { %p3094_p11 = scmp.ne.s32.totalorder %s21_s12, %s3093_s20  ;;  %p3099_p13 = scmp.lt.s32.totalorder %s3093_s20, %s3093_s20 }
  0x1e   :  { %p3100_p0 = por %p3099_p13, %p3098_p12 }
  0x20   :  { %p3101_p1 = pnand %p3100_p0, %p3094_p11 }
  0x22   :  { %3104 = shalt.err (!%p3101_p1)
}
  0x23   :  { %s3183_s1 = smov 128   ;;  %s3184_s21 = smov 8  }
  0x24   :  { %26 = dma.hbm_to_vmem [thread:$0]  %s3933_s0, 1024, %s21_s12, [#allocation4], %s3183_s1, %s3183_s1, %s3184_s21  }
  0x25   :  { %s3185_s24 = smov [#allocation8]   ;;  %s3105_s28 = scalar_lea.hbm %s3935_s2, 4096 }
  0x26   :  { %s44_s25 = sshll.u32 %s3185_s24, 4  ;;  %p3106_p2 = scmp.ne.s32.totalorder %s3935_s2, %s3105_s28  ;;  %s45_s25 = int_to_ptr.vmem [resolvable:$true] %s44_s25 }
  0x27   :  { %p3109_p3 = scmp.lt.u32.totalorder %s3105_s28, %s3935_s2 }
  0x29   :  { %p3111_p4 = pnand %p3109_p3, %p3106_p2 }
  0x2b   :  { %3114 = shalt.err (!%p3111_p4)
}
  0x2c   :  { %s3115_s9 = scalar_lea.vmem %s45_s25, 4096  ;;  %p3120_p6 = scmp.lt.s32.totalorder %s45_s25, %s45_s25 }
  0x2d   :  { %p3116_p5 = scmp.ne.s32.totalorder %s45_s25, %s3115_s9  ;;  %p3121_p7 = scmp.lt.s32.totalorder %s3115_s9, %s3115_s9 }
  0x2f   :  { %p3122_p8 = por %p3121_p7, %p3120_p6 }
  0x31   :  { %p3123_p9 = pnand %p3122_p8, %p3116_p5 }
  0x33   :  { %3126 = shalt.err (!%p3123_p9)
}
  0x34   :  { %s3186_s0 = smov 256   ;;  %s3187_s10 = smov 16  }
  0x35   :  { %50 = dma.hbm_to_vmem [thread:$0]  %s3935_s2, 4096, %s45_s25, [#allocation7], %s3186_s0, %s3186_s0, %s3187_s10  }
  0x36   :  { %s3188_s13 = smov [#allocation9]   ;;  %s3127_s17 = scalar_lea.hbm %s3937_s4, 2048 }
  0x37   :  { %s58_s14 = sshll.u32 %s3188_s13, 4  ;;  %p3128_p10 = scmp.ne.s32.totalorder %s3937_s4, %s3127_s17  ;;  %s59_s14 = int_to_ptr.vmem [resolvable:$true] %s58_s14 }
  0x38   :  { %p3131_p11 = scmp.lt.u32.totalorder %s3127_s17, %s3937_s4 }
  0x3a   :  { %p3133_p12 = pnand %p3131_p11, %p3128_p10 }
  0x3c   :  { %3136 = shalt.err (!%p3133_p12)
}
  0x3d   :  { %s3137_s23 = scalar_lea.vmem %s59_s14, 2048  ;;  %p3142_p0 = scmp.lt.s32.totalorder %s59_s14, %s59_s14 }
  0x3e   :  { %p3138_p13 = scmp.ne.s32.totalorder %s59_s14, %s3137_s23  ;;  %p3143_p1 = scmp.lt.s32.totalorder %s3137_s23, %s3137_s23 }
  0x40   :  { %p3144_p2 = por %p3143_p1, %p3142_p0 }
  0x42   :  { %p3145_p3 = pnand %p3144_p2, %p3138_p13 }
  0x44   :  { %3148 = shalt.err (!%p3145_p3)
}
  0x45   :  { %64 = dma.hbm_to_vmem [thread:$0]  %s3937_s4, 2048, %s59_s14, [#allocation10], %s3183_s1, %s3183_s1, %s3184_s21  }
  0x46   :  { %3171 = dma.done.wait [#allocation4], 1024  }
  0x47   :  { %3172 = vsyncadd [#allocation4], 4294966272 }
  0x48   :  { %3173 = dma.done.wait [#allocation7], 5120  }
  0x49   :  { %3174 = vsyncadd [#allocation7], 4294962176 }
  0x4a   :  { %3175 = dma.done.wait [#allocation10], 2048  }
  0x4b   :  { %3176 = vsyncadd [#allocation10], 4294965248  ;;  %v3940_v0 = vmov 0.0   ;;  %vm115_vm0 = vcmask 1043456   ;;  %vm3190_vm1 = vmmov 1   ;;  %v81_v2 = vld [vmem:[#allocation6 + $0x8] sm:$0xff]  ;;  %v91_v55 = vlaneseq }
  0x4c   :  { %192 = vmatprep.mubr.f32.mxu1 %v3940_v0  ;;  %647 = vmatprep.mubr.f32.mxu0 %v3940_v0  ;;  %vm3286_vm2 = vmpackc.low %vm115_vm0, %vm3190_vm1  ;;  %v85_v3 = vld [vmem:[#allocation6 + $0x28] sm:$0xf]  ;;  %v80_v4 = vld [vmem:[#allocation6] sm:$0xff]  ;;  %vm111_vm3 = vcmask 97280   ;;  %v3941_v27 = vmov 0   ;;  %vm3193_vm4 = vmmov 0  }
  0x4d   :  { %v2717_v5 = vpack.c.bf16 %v85_v3, %v81_v2  ;;  %v84_v6 = vld [vmem:[#allocation6 + $0x20] sm:$0xf]  ;;  %v83_v7 = vld [vmem:[#allocation6 + $0x18] sm:$0xff]  ;;  %v82_v10 = vld [vmem:[#allocation6 + $0x10] sm:$0xff]  ;;  %v92_v56 = vshrl.u32 %v91_v55, 7  ;;  %s3194_s25 = smov [#allocation11]  }
  0x4e   :  { %v2720_v8 = vpack.c.bf16 %v84_v6, %v80_v4  ;;  %v87_v9 = vld [vmem:[#allocation6 + $0x38] sm:$0xf]  ;;  %v86_v11 = vld [vmem:[#allocation6 + $0x30] sm:$0xf]  ;;  %v89_v13 = vld [vmem:[#allocation3] sm:$0xff]  ;;  %s2549_s26 = sshll.u32 %s3194_s25, 4  ;;  %s2550_s26 = int_to_ptr.vmem [resolvable:$true] %s2549_s26 }
  0x4f   :  { %2719 = vmatprep.subr.msk.bf16.mxu1 %vm3286_vm2, %v2717_v5  ;;  %2755 = vmatprep.subr.msk.bf16.mxu0 %vm3286_vm2, %v2717_v5  ;;  %v3294_v12 = vpack.c.bf16 %v87_v9, %v83_v7  ;;  %v3300_v14 = vpack.c.bf16 %v86_v11, %v82_v10  ;;  %v3302_v15 = vld [vmem:[#allocation3 + $0x18] sm:$0xff]  ;;  %v3317_v16 = vld [vmem:[#allocation3 + $0x20] sm:$0xff]  ;;  %v275_v17 = vld [vmem:[#allocation3 + $0x8] sm:$0xff]  ;;  %v93_v57 = vsub.s32 0, %v92_v56  ;;  %v97_v59 = vsub.s32 1, %v92_v56  ;;  %s3149_s27 = scalar_lea.vmem %s2550_s26, 128  ;;  %p3154_p5 = scmp.lt.s32.totalorder %s2550_s26, %s2550_s26 }
  0x50   :  { %2722 = vmatpush1.bf16.msk.msra.mxu1 %vm3286_vm2, %v2720_v8  ;;  %2758 = vmatpush1.bf16.msk.msra.mxu0 %vm3286_vm2, %v2720_v8  ;;  %v883_v18 = vld [vmem:[#allocation3 + $0x28] sm:$0xff]  ;;  %v1035_v19 = vld [vmem:[#allocation3 + $0x30] sm:$0xff]  ;;  %v3356_v22 = vld [vmem:[#allocation3 + $0x38] sm:$0xff]  ;;  %v101_v11 = vsub.s32 2, %v92_v56  ;;  %p3150_p4 = scmp.ne.s32.totalorder %s2550_s26, %s3149_s27  ;;  %p3155_p6 = scmp.lt.s32.totalorder %s3149_s27, %s3149_s27 }
  0x51   :  { %2725 = vmatprep.subr.msk.bf16.mxu1 %vm3286_vm2, %v3294_v12  ;;  %2767 = vmatprep.subr.msk.bf16.mxu0 %vm3286_vm2, %v2717_v5  ;;  %v3352_v20 = vld [vmem:[#allocation8 + $0x4] ss:$16 sps:$4 sm:$0xff]   ;;  %v3362_v23 = vld [vmem:[#allocation8] ss:$16 sps:$4 sm:$0xff]   ;;  %v3447_v36 = vld [vmem:[#allocation8 + $0xc] ss:$16 sps:$4 sm:$0xff]  }
  0x52   :  { %v427_v21 = vld [vmem:[#allocation3 + $0x10] sm:$0xff]  ;;  %v3456_v38 = vld [vmem:[#allocation8 + $0x8] ss:$16 sps:$4 sm:$0xff]   ;;  %v3462_v40 = vld [vmem:[#allocation8 + $0x2c] ss:$16 sps:$4 sm:$0xff]   ;;  %p3156_p7 = por %p3155_p6, %p3154_p5 }
  0x53   :  { %2562 = vmatmul.mubr.msk.f32.vlgmr.msra.gmra.mrb[0].mxu1 %vm111_vm3, %v89_v13  ;;  %2580 = vmatmul.mubr.msk.f32.vlgmr.msra.gmra.mrb[0].mxu0 %vm111_vm3, %v3302_v15  ;;  %v3370_v24 = vld [vmem:[#allocation8 + $0x24] ss:$16 sps:$4 sm:$0xff]   ;;  %v3379_v25 = vld [vmem:[#allocation8 + $0x20] ss:$16 sps:$4 sm:$0xff]   ;;  %v3471_v42 = vld [vmem:[#allocation8 + $0x28] ss:$16 sps:$4 sm:$0xff]  }
  0x54   :  { %2728 = vmatpush1.bf16.msk.msra.mxu1 %vm3286_vm2, %v3300_v14  ;;  %2770 = vmatpush1.bf16.msk.msra.mxu0 %vm3286_vm2, %v2720_v8  ;;  %v3386_v26 = vld [vmem:[#allocation8 + $0x44] ss:$16 sps:$4 sm:$0xff]   ;;  %v3394_v28 = vld [vmem:[#allocation8 + $0x40] ss:$16 sps:$4 sm:$0xff]   ;;  %v3475_v43 = vld [vmem:[#allocation8 + $0x4c] ss:$16 sps:$4 sm:$0xff]   ;;  %p3157_p8 = pnand %p3156_p7, %p3150_p4 }
  0x55   :  { %263 = vmatprep.mubr.f32.mxu1 %v3940_v0  ;;  %2731 = vmatprep.subr.msk.bf16.mxu1 %vm3286_vm2, %v2717_v5  ;;  %v3401_v29 = vld [vmem:[#allocation8 + $0x64] ss:$16 sps:$4 sm:$0xff]   ;;  %v3409_v30 = vld [vmem:[#allocation8 + $0x60] ss:$16 sps:$4 sm:$0xff]   ;;  %v3480_v44 = vld [vmem:[#allocation8 + $0x48] ss:$16 sps:$4 sm:$0xff]  }
  0x56   :  { %799 = vmatprep.mubr.f32.mxu0 %v3940_v0  ;;  %2779 = vmatprep.subr.msk.bf16.mxu0 %vm3286_vm2, %v2717_v5  ;;  %v3416_v31 = vld [vmem:[#allocation8 + $0x84] ss:$16 sps:$4 sm:$0xff]   ;;  %v3424_v32 = vld [vmem:[#allocation8 + $0x80] ss:$16 sps:$4 sm:$0xff]   ;;  %v3483_v45 = vld [vmem:[#allocation8 + $0x6c] ss:$16 sps:$4 sm:$0xff]  }
  0x57   :  { %2565 = vmatmul.mubr.msk.f32.vlgmr.msra.gmra.mrb[2].mxu1 %vm111_vm3, %v89_v13  ;;  %2586 = vmatmul.mubr.msk.f32.vlgmr.msra.gmra.mrb[2].mxu0 %vm111_vm3, %v3317_v16  ;;  %v3431_v33 = vld [vmem:[#allocation8 + $0xa4] ss:$16 sps:$4 sm:$0xff]   ;;  %v3438_v34 = vld [vmem:[#allocation8 + $0xa0] ss:$16 sps:$4 sm:$0xff]   ;;  %v3488_v46 = vld [vmem:[#allocation8 + $0x68] ss:$16 sps:$4 sm:$0xff]  }
  0x58   :  { %2734 = vmatpush1.bf16.msk.msra.mxu1 %vm3286_vm2, %v2720_v8  ;;  %2782 = vmatpush1.bf16.msk.msra.mxu0 %vm3286_vm2, %v2720_v8  ;;  %v3444_v35 = vld [vmem:[#allocation8 + $0xc4] ss:$16 sps:$4 sm:$0xff]   ;;  %v3454_v37 = vld [vmem:[#allocation8 + $0xc0] ss:$16 sps:$4 sm:$0xff]   ;;  %v3492_v47 = vld [vmem:[#allocation8 + $0x8c] ss:$16 sps:$4 sm:$0xff]  }
  0x59   :  { %343 = vmatprep.mubr.f32.mxu1 %v3940_v0  ;;  %2737 = vmatprep.subr.msk.bf16.mxu1 %vm3286_vm2, %v3294_v12  ;;  %v3460_v39 = vld [vmem:[#allocation8 + $0xe4] ss:$16 sps:$4 sm:$0xff]   ;;  %v3469_v41 = vld [vmem:[#allocation8 + $0xe0] ss:$16 sps:$4 sm:$0xff]   ;;  %v3497_v48 = vld [vmem:[#allocation8 + $0x88] ss:$16 sps:$4 sm:$0xff]  }
  0x5a   :  { %951 = vmatprep.mubr.f32.mxu0 %v3940_v0  ;;  %2791 = vmatprep.subr.msk.bf16.mxu0 %vm3286_vm2, %v2717_v5  ;;  %v3501_v49 = vld [vmem:[#allocation8 + $0xac] ss:$16 sps:$4 sm:$0xff]   ;;  %v3505_v50 = vld [vmem:[#allocation8 + $0xa8] ss:$16 sps:$4 sm:$0xff]   ;;  %v88_v58 = vld [vmem:[%s3936_s3] sm:$0xf] }
  0x5b   :  { %2568 = vmatmul.mubr.msk.f32.vlgmr.msra.gmra.mrb[4].mxu1 %vm111_vm3, %v275_v17  ;;  %2592 = vmatmul.mubr.msk.f32.vlgmr.msra.gmra.mrb[4].mxu0 %vm111_vm3, %v883_v18  ;;  %v3509_v51 = vld [vmem:[#allocation8 + $0xcc] ss:$16 sps:$4 sm:$0xff]   ;;  %v3513_v52 = vld [vmem:[#allocation8 + $0xc8] ss:$16 sps:$4 sm:$0xff]   ;;  %v3555_v60 = vrot.slane %v88_v58, %v93_v57  ;;  %v3559_v62 = vrot.slane %v88_v58, %v97_v59 }
  0x5c   :  { %2740 = vmatpush1.bf16.msk.msra.mxu1 %vm3286_vm2, %v3300_v14  ;;  %2794 = vmatpush1.bf16.msk.msra.mxu0 %vm3286_vm2, %v2720_v8  ;;  %v3517_v53 = vld [vmem:[#allocation8 + $0xec] ss:$16 sps:$4 sm:$0xff]   ;;  %v3521_v54 = vld [vmem:[#allocation8 + $0xe8] ss:$16 sps:$4 sm:$0xff]  }
  0x5d   :  { %414 = vmatprep.mubr.f32.mxu1 %v3940_v0  ;;  %2743 = vmatprep.subr.msk.bf16.mxu1 %vm3286_vm2, %v2717_v5 }
  0x5e   :  { %1103 = vmatprep.mubr.f32.mxu0 %v3940_v0  ;;  %2803 = vmatprep.subr.msk.bf16.mxu0 %vm3286_vm2, %v2717_v5 }
  0x5f   :  { %2571 = vmatmul.mubr.msk.f32.vlgmr.msra.gmra.mrb[6].mxu1 %vm111_vm3, %v275_v17  ;;  %2598 = vmatmul.mubr.msk.f32.vlgmr.msra.gmra.mrb[6].mxu0 %vm111_vm3, %v1035_v19 }
  0x60   :  { %2746 = vmatpush1.bf16.msk.msra.mxu1 %vm3286_vm2, %v2720_v8  ;;  %2806 = vmatpush1.bf16.msk.msra.mxu0 %vm3286_vm2, %v2720_v8 }
  0x61   :  { %495 = vmatprep.mubr.f32.mxu1 %v3940_v0  ;;  %2749 = vmatprep.subr.msk.bf16.mxu1 %vm3286_vm2, %v3294_v12 }
  0x62   :  { %1255 = vmatprep.mubr.f32.mxu0 %v3940_v0  ;;  %1534 = vmatprep.subr.bf16.mxu0 %v3352_v20 }
  0x63   :  { %2574 = vmatmul.mubr.msk.f32.vlgmr.msra.gmra.mrb[8].mxu1 %vm111_vm3, %v427_v21  ;;  %2604 = vmatmul.mubr.msk.f32.vlgmr.msra.gmra.mrb[8].mxu0 %vm111_vm3, %v3356_v22 }
  0x64   :  { %2752 = vmatpush1.bf16.msk.msra.mxu1 %vm3286_vm2, %v3300_v14  ;;  %1535 = vmatpush1.bf16.msra.mxu0 %v3362_v23 }
  0x65   :  { %566 = vmatprep.mubr.f32.mxu1 %v3940_v0  ;;  %2761 = vmatprep.subr.msk.bf16.mxu1 %vm3286_vm2, %v3294_v12 }
  0x66   :  { %1536 = vmatprep.subr.bf16.mxu0 %v3370_v24  ;;  %1566 = vmatprep.mubr.bf16.mxu0 %v3941_v27 }
  0x67   :  { %2577 = vmatmul.mubr.msk.f32.vlgmr.msra.gmra.mrb[10].mxu1 %vm111_vm3, %v427_v21 }
  0x68   :  { %2764 = vmatpush1.bf16.msk.msra.mxu1 %vm3286_vm2, %v3300_v14  ;;  %1537 = vmatpush1.bf16.msra.mxu0 %v3379_v25 }
  0x69   :  { %718 = vmatprep.mubr.f32.mxu1 %v3940_v0  ;;  %2773 = vmatprep.subr.msk.bf16.mxu1 %vm3286_vm2, %v3294_v12 }
  0x6a   :  { %1538 = vmatprep.subr.bf16.mxu0 %v3386_v26 }
  0x6b   :  { %2583 = vmatmul.mubr.msk.f32.vlgmr.msra.gmra.mrb[12].mxu1 %vm111_vm3, %v3302_v15 }
  0x6c   :  { %2776 = vmatpush1.bf16.msk.msra.mxu1 %vm3286_vm2, %v3300_v14  ;;  %1539 = vmatpush1.bf16.msra.mxu0 %v3394_v28 }
  0x6d   :  { %870 = vmatprep.mubr.f32.mxu1 %v3940_v0  ;;  %2785 = vmatprep.subr.msk.bf16.mxu1 %vm3286_vm2, %v3294_v12 }
  0x6e   :  { %1540 = vmatprep.subr.bf16.mxu0 %v3401_v29 }
  0x6f   :  { %2589 = vmatmul.mubr.msk.f32.vlgmr.msra.gmra.mrb[14].mxu1 %vm111_vm3, %v3317_v16 }
  0x70   :  { %2788 = vmatpush1.bf16.msk.msra.mxu1 %vm3286_vm2, %v3300_v14  ;;  %1541 = vmatpush1.bf16.msra.mxu0 %v3409_v30 }
  0x71   :  { %1022 = vmatprep.mubr.f32.mxu1 %v3940_v0  ;;  %2797 = vmatprep.subr.msk.bf16.mxu1 %vm3286_vm2, %v3294_v12 }
  0x72   :  { %1542 = vmatprep.subr.bf16.mxu0 %v3416_v31 }
  0x73   :  { %2595 = vmatmul.mubr.msk.f32.vlgmr.msra.gmra.mrb[16].mxu1 %vm111_vm3, %v883_v18 }
  0x74   :  { %2800 = vmatpush1.bf16.msk.msra.mxu1 %vm3286_vm2, %v3300_v14  ;;  %1543 = vmatpush1.bf16.msra.mxu0 %v3424_v32 }
  0x75   :  { %1174 = vmatprep.mubr.f32.mxu1 %v3940_v0  ;;  %2809 = vmatprep.subr.msk.bf16.mxu1 %vm3286_vm2, %v3294_v12  ;;  %v105_v12 = vsub.s32 3, %v92_v56 }
  0x76   :  { %1544 = vmatprep.subr.bf16.mxu0 %v3431_v33 }
  0x77   :  { %2601 = vmatmul.mubr.msk.f32.vlgmr.msra.gmra.mrb[18].mxu1 %vm111_vm3, %v1035_v19  ;;  %v106_v55 = vrot.slane %v88_v58, %v105_v12 }
  0x78   :  { %2812 = vmatpush1.bf16.msk.msra.mxu1 %vm3286_vm2, %v3300_v14  ;;  %1545 = vmatpush1.bf16.msra.mxu0 %v3438_v34 }
  0x79   :  { %1326 = vmatprep.mubr.f32.mxu1 %v3940_v0  ;;  %1546 = vmatprep.subr.bf16.mxu0 %v3444_v35 }
  0x7a   :  { %1575 = vmatprep.subr.bf16.mxu1 %v3447_v36 }
  0x7b   :  { %2607 = vmatmul.mubr.msk.f32.vlgmr.msra.gmra.mrb[20].mxu1 %vm111_vm3, %v3356_v22  ;;  %v102_v22 = vrot.slane %v88_v58, %v101_v11 }
  0x7c   :  { %1547 = vmatpush1.bf16.msra.mxu0 %v3454_v37  ;;  %1576 = vmatpush1.bf16.msra.mxu1 %v3456_v38 }
  0x7d   :  { %1548 = vmatprep.subr.bf16.mxu0 %v3460_v39  ;;  %1577 = vmatprep.subr.bf16.mxu1 %v3462_v40 }
  0x7e   :  { %1607 = vmatprep.mubr.bf16.mxu1 %v3941_v27 }
  0x80   :  { %1549 = vmatpush1.bf16.msra.mxu0 %v3469_v41  ;;  %1578 = vmatpush1.bf16.msra.mxu1 %v3471_v42 }
  0x81   :  { %1579 = vmatprep.subr.bf16.mxu1 %v3475_v43  ;;  %1649 = vmatprep.subr.bf16.mxu0 %v3352_v20 }
  0x83   :  { %1567 = vmatmul.mubr.bf16.vlgmr.msra.gmra.mrb[12].mxu0 %v3941_v27 }
  0x84   :  { %1580 = vmatpush1.bf16.msra.mxu1 %v3480_v44  ;;  %1650 = vmatpush1.bf16.msra.mxu0 %v3362_v23 }
  0x85   :  { %1581 = vmatprep.subr.bf16.mxu1 %v3483_v45  ;;  %1651 = vmatprep.subr.bf16.mxu0 %v3370_v24 }
  0x86   :  { %1681 = vmatprep.mubr.bf16.mxu0 %v3941_v27 }
  0x88   :  { %1582 = vmatpush1.bf16.msra.mxu1 %v3488_v46  ;;  %1652 = vmatpush1.bf16.msra.mxu0 %v3379_v25 }
  0x89   :  { %1583 = vmatprep.subr.bf16.mxu1 %v3492_v47  ;;  %1653 = vmatprep.subr.bf16.mxu0 %v3386_v26 }
  0x8c   :  { %1584 = vmatpush1.bf16.msra.mxu1 %v3497_v48  ;;  %1654 = vmatpush1.bf16.msra.mxu0 %v3394_v28 }
  0x8d   :  { %1585 = vmatprep.subr.bf16.mxu1 %v3501_v49  ;;  %1655 = vmatprep.subr.bf16.mxu0 %v3401_v29 }
  0x90   :  { %1586 = vmatpush1.bf16.msra.mxu1 %v3505_v50  ;;  %1656 = vmatpush1.bf16.msra.mxu0 %v3409_v30 }
  0x91   :  { %1587 = vmatprep.subr.bf16.mxu1 %v3509_v51  ;;  %1657 = vmatprep.subr.bf16.mxu0 %v3416_v31 }
  0x94   :  { %1588 = vmatpush1.bf16.msra.mxu1 %v3513_v52  ;;  %1658 = vmatpush1.bf16.msra.mxu0 %v3424_v32 }
  0x95   :  { %1589 = vmatprep.subr.bf16.mxu1 %v3517_v53  ;;  %1659 = vmatprep.subr.bf16.mxu0 %v3431_v33 }
  0x98   :  { %1590 = vmatpush1.bf16.msra.mxu1 %v3521_v54  ;;  %1660 = vmatpush1.bf16.msra.mxu0 %v3438_v34 }
  0x99   :  { %1690 = vmatprep.subr.bf16.mxu1 %v3447_v36  ;;  %1661 = vmatprep.subr.bf16.mxu0 %v3444_v35 }
  0x9b   :  { %1608 = vmatmul.mubr.bf16.vlgmr.msra.gmra.mrb[24].mxu1 %v3941_v27 }
  0x9c   :  { %1691 = vmatpush1.bf16.msra.mxu1 %v3456_v38  ;;  %1662 = vmatpush1.bf16.msra.mxu0 %v3454_v37 }
  0x9d   :  { %1692 = vmatprep.subr.bf16.mxu1 %v3462_v40  ;;  %1663 = vmatprep.subr.bf16.mxu0 %v3460_v39 }
  0x9e   :  { %1722 = vmatprep.mubr.bf16.mxu1 %v3941_v27 }
  0xa0   :  { %1693 = vmatpush1.bf16.msra.mxu1 %v3471_v42  ;;  %1664 = vmatpush1.bf16.msra.mxu0 %v3469_v41 }
  0xa1   :  { %1694 = vmatprep.subr.bf16.mxu1 %v3475_v43  ;;  %1764 = vmatprep.subr.bf16.mxu0 %v3352_v20 }
  0xa4   :  { %1695 = vmatpush1.bf16.msra.mxu1 %v3480_v44 }
  0xa5   :  { %1696 = vmatprep.subr.bf16.mxu1 %v3483_v45 }
  0xa8   :  { %1697 = vmatpush1.bf16.msra.mxu1 %v3488_v46 }
  0xa9   :  { %1698 = vmatprep.subr.bf16.mxu1 %v3492_v47 }
  0xac   :  { %1699 = vmatpush1.bf16.msra.mxu1 %v3497_v48 }
  0xad   :  { %1700 = vmatprep.subr.bf16.mxu1 %v3501_v49 }
  0xb0   :  { %1701 = vmatpush1.bf16.msra.mxu1 %v3505_v50 }
  0xb1   :  { %1702 = vmatprep.subr.bf16.mxu1 %v3509_v51 }
  0xb4   :  { %1703 = vmatpush1.bf16.msra.mxu1 %v3513_v52 }
  0xb5   :  { %1704 = vmatprep.subr.bf16.mxu1 %v3517_v53 }
  0xb8   :  { %1705 = vmatpush1.bf16.msra.mxu1 %v3521_v54 }
  0xb9   :  { %1805 = vmatprep.subr.bf16.mxu1 %v3447_v36 }
 0x126   :  { %v3557_v61 = vpop.f32.mrb[0].mxu1  ;;  %v649_v63 = vpop.f32.mrb[0].mxu0 }
 0x127   :  { %v3561_v1 = vpop.f32.mrb[1].mxu1  ;;  %v3564_v2 = vadd.f32 %v649_v63, %v3555_v60  ;;  %v651_v3 = vpop.f32.mrb[1].mxu0 }
 0x128   :  { %v3567_v4 = vadd.f32 %v651_v3, %v3559_v62 }
 0x12a   :  { %3945 = vst [vmem:[#allocation16_spill] sm:$0xff] %v3567_v4  ;;  %v3569_v5 = vpop.f32.mrb[2].mxu1  ;;  %v801_v6 = vpop.f32.mrb[2].mxu0 }
 0x12b   :  { %v3571_v7 = vpop.f32.mrb[3].mxu1  ;;  %v3574_v8 = vadd.f32 %v801_v6, %v3555_v60  ;;  %v803_v9 = vpop.f32.mrb[3].mxu0 }
 0x12c   :  { %v3577_v10 = vadd.f32 %v803_v9, %v3559_v62 }
 0x12d   :  { %3946 = vst [vmem:[#allocation17_spill] sm:$0xff] %v3574_v8 }
 0x12e   :  { %3947 = vst [vmem:[#allocation18_spill] sm:$0xff] %v3577_v10  ;;  %v345_v13 = vpop.f32.mrb[4].mxu1  ;;  %v953_v14 = vpop.f32.mrb[4].mxu0 }
 0x12f   :  { %v3580_v15 = vadd.f32 %v345_v13, %v3555_v60  ;;  %v347_v16 = vpop.f32.mrb[5].mxu1  ;;  %v3583_v17 = vadd.f32 %v953_v14, %v3555_v60  ;;  %v955_v18 = vpop.f32.mrb[5].mxu0 }
 0x130   :  { %v3586_v19 = vadd.f32 %v347_v16, %v3559_v62  ;;  %v3589_v21 = vadd.f32 %v955_v18, %v3559_v62 }
 0x131   :  { %3948 = vst [vmem:[#allocation19_spill] sm:$0xff] %v3583_v17 }
 0x132   :  { %3949 = vst [vmem:[#allocation20_spill] sm:$0xff] %v3589_v21  ;;  %v416_v57 = vpop.f32.mrb[6].mxu1  ;;  %v1105_v56 = vpop.f32.mrb[6].mxu0 }
 0x133   :  { %v3591_v59 = vadd.f32 %v416_v57, %v102_v22  ;;  %v418_v63 = vpop.f32.mrb[7].mxu1  ;;  %v3594_v3 = vadd.f32 %v1105_v56, %v3555_v60  ;;  %v1107_v6 = vpop.f32.mrb[7].mxu0 }
 0x134   :  { %v3596_v9 = vadd.f32 %v418_v63, %v106_v55  ;;  %v3599_v13 = vadd.f32 %v1107_v6, %v3559_v62 }
 0x135   :  { %3950 = vst [vmem:[#allocation21_spill] sm:$0xff] %v3594_v3 }
 0x136   :  { %3951 = vst [vmem:[#allocation22_spill] sm:$0xff] %v3599_v13  ;;  %v497_v14 = vpop.f32.mrb[8].mxu1  ;;  %v1257_v16 = vpop.f32.mrb[8].mxu0 }
 0x137   :  { %v3602_v18 = vadd.f32 %v497_v14, %v3555_v60  ;;  %v499_v58 = vpop.f32.mrb[9].mxu1  ;;  %v3605_v11 = vadd.f32 %v1257_v16, %v3555_v60  ;;  %v1259_v12 = vpop.f32.mrb[9].mxu0 }
 0x138   :  { %v3608_v57 = vadd.f32 %v499_v58, %v3559_v62  ;;  %v3611_v56 = vadd.f32 %v1259_v12, %v3559_v62 }
 0x139   :  { %3952 = vst [vmem:[#allocation23_spill] sm:$0xff] %v3605_v11 }
 0x13a   :  { %3953 = vst [vmem:[#allocation24_spill] sm:$0xff] %v3611_v56  ;;  %v568_v63 = vpop.f32.mrb[10].mxu1 }
 0x13b   :  { %v3613_v0 = vadd.f32 %v568_v63, %v102_v22  ;;  %v570_v6 = vpop.f32.mrb[11].mxu1 }
 0x13c   :  { %v3615_v27 = vadd.f32 %v570_v6, %v106_v55 }
 0x13e   :  { %v720_v13 = vpop.f32.mrb[12].mxu1 }
 0x13f   :  { %v3617_v14 = vadd.f32 %v720_v13, %v102_v22  ;;  %v722_v3 = vpop.f32.mrb[13].mxu1 }
 0x140   :  { %v3619_v21 = vadd.f32 %v722_v3, %v106_v55 }
 0x141   :  { %3954 = vst [vmem:[#allocation25_spill] sm:$0xff] %v3617_v14 }
 0x142   :  { %3955 = vst [vmem:[#allocation26_spill] sm:$0xff] %v3619_v21  ;;  %v872_v16 = vpop.f32.mrb[14].mxu1 }
 0x143   :  { %v3621_v11 = vadd.f32 %v872_v16, %v102_v22  ;;  %v874_v58 = vpop.f32.mrb[15].mxu1 }
 0x144   :  { %v3623_v17 = vadd.f32 %v874_v58, %v106_v55  ;;  %v195_v58 = vadd.f32 %v3557_v61, %v3555_v60  ;;  %v268_v60 = vadd.f32 %v3571_v7, %v106_v55 }
 0x145   :  { %3956 = vst [vmem:[#allocation27_spill] sm:$0xff] %v3621_v11 }
 0x146   :  { %3957 = vst [vmem:[#allocation28_spill] sm:$0xff] %v3623_v17  ;;  %v1024_v12 = vpop.f32.mrb[16].mxu1 }
 0x147   :  { %v3625_v56 = vadd.f32 %v1024_v12, %v102_v22  ;;  %v1026_v63 = vpop.f32.mrb[17].mxu1  ;;  %v197_v12 = vadd.f32 %v3561_v1, %v3559_v62 }
 0x148   :  { %v3627_v10 = vadd.f32 %v1026_v63, %v106_v55 }
 0x149   :  { %3958 = vst [vmem:[#allocation29_spill] sm:$0xff] %v3625_v56 }
 0x14a   :  { %3959 = vst [vmem:[#allocation30_spill] sm:$0xff] %v3627_v10  ;;  %v1176_v6 = vpop.f32.mrb[18].mxu1 }
 0x14b   :  { %v3629_v8 = vadd.f32 %v1176_v6, %v102_v22  ;;  %v1178_v13 = vpop.f32.mrb[19].mxu1 }
 0x14c   :  { %v3631_v4 = vadd.f32 %v1178_v13, %v106_v55 }
 0x14d   :  { %3960 = vst [vmem:[#allocation31_spill] sm:$0xff] %v3629_v8 }
 0x14e   :  { %3961 = vst [vmem:[#allocation32_spill] sm:$0xff] %v3631_v4  ;;  %v1328_v3 = vpop.f32.mrb[20].mxu1 }
 0x14f   :  { %v3633_v21 = vadd.f32 %v1328_v3, %v102_v22  ;;  %v1330_v16 = vpop.f32.mrb[21].mxu1 }
 0x150   :  { %v3635_v11 = vadd.f32 %v1330_v16, %v106_v55 }
 0x151   :  { %3962 = vst [vmem:[#allocation33_spill] sm:$0xff] %v3633_v21 }
 0x152   :  { %3963 = vst [vmem:[#allocation34_spill] sm:$0xff] %v3635_v11  ;;  %v266_v11 = vadd.f32 %v3569_v5, %v102_v22 }
 0x156   :  { %v1568_v63 = vpop.f32.mrb[12].mxu0 }
 0x157   :  { %v1616_v10 = vadd.f32 %v1568_v63, %v195_v58  ;;  %v1570_v56 = vpop.f32.mrb[13].mxu0 }
 0x158   :  { %v1617_v6 = vadd.f32 %v1570_v56, %v197_v12  ;;  %v1572_v8 = vpop.f32.mrb[14].mxu0 }
 0x159   :  { %v1573_v17 = vpop.f32.mrb[15].mxu0  ;;  %v2640_v4 = vmul.f32 -1.442695, %v1616_v10 }
 0x15a   :  { %v2641_v13 = vmul.f32 -1.442695, %v1617_v6 }
 0x15c   :  { %2901 = vpow2.f32 %v2641_v13  ;;  %v3964_v13 = vmov 0  }
 0x15d   :  { %2903 = vpow2.f32 %v2640_v4 }
 0x166   :  { %v2902_v3 = vpop.eup %2901 }
 0x167   :  { %v2904_v21 = vpop.eup %2903  ;;  %v1630_v16 = vadd.f32 1.0, %v2902_v3 }
 0x168   :  { %v1629_v14 = vadd.f32 1.0, %v2904_v21 }
 0x169   :  { %2905 = vrcp.f32 %v1630_v16 }
 0x16a   :  { %2907 = vrcp.f32 %v1629_v14 }
 0x16e   :  { %v1609_v61 = vpop.f32.mrb[24].mxu1 }
 0x16f   :  { %v1618_v62 = vadd.f32 %v1609_v61, %v266_v11  ;;  %v1611_v1 = vpop.f32.mrb[25].mxu1 }
 0x170   :  { %v1619_v58 = vadd.f32 %v1611_v1, %v268_v60  ;;  %v1613_v56 = vpop.f32.mrb[26].mxu1 }
 0x171   :  { %v2642_v8 = vmul.f32 -1.442695, %v1618_v62  ;;  %v1614_v17 = vpop.f32.mrb[27].mxu1 }
 0x172   :  { %2909 = vtanh.f32 %v1619_v58 }
 0x173   :  { %2911 = vpow2.f32 %v2642_v8  ;;  %v2906_v4 = vpop.eup %2905 }
 0x174   :  { %v2908_v10 = vpop.eup %2907  ;;  %v1639_v6 = vmul.f32 0.0, %v2906_v4 }
 0x17c   :  { %v2910_v12 = vpop.eup %2909 }
 0x17d   :  { %v2912_v63 = vpop.eup %2911  ;;  %v1640_v5 = vmul.f32 %v2910_v12, %v2908_v10 }
 0x17e   :  { %v1631_v21 = vadd.f32 1.0, %v2912_v63 }
 0x17f   :  { %v3643_v22 = vadd.f32 %v1640_v5, %v1639_v6 }
 0x180   :  { %2913 = vrcp.f32 %v1631_v21 }
 0x181   :  { %2915 = vtanh.f32 %v3643_v22 }
 0x18a   :  { %v2914_v7 = vpop.eup %2913 }
 0x18b   :  { %v2916_v55 = vpop.eup %2915 }
 0x18c   :  { %v1643_v11 = vmul.f32 %v2916_v55, %v2914_v7 }
 0x18e   :  { %v1648_v14 = vpack.c.bf16 %v1643_v11, %v1643_v11 }
 0x190   :  { %1682 = vmatmul.mubr.bf16.vlgmr.msra.gmra.mrb[16].mxu0 %v1648_v14  ;;  %1723 = vmatmul.mubr.bf16.vlgmr.msra.gmra.mrb[28].mxu1 %v1648_v14 }
 0x191   :  { %1765 = vmatpush1.bf16.msra.mxu0 %v3362_v23  ;;  %1806 = vmatpush1.bf16.msra.mxu1 %v3456_v38 }
 0x192   :  { %1766 = vmatprep.subr.bf16.mxu0 %v3370_v24  ;;  %1807 = vmatprep.subr.bf16.mxu1 %v3462_v40 }
 0x193   :  { %1796 = vmatprep.mubr.bf16.mxu0 %v3964_v13  ;;  %1837 = vmatprep.mubr.bf16.mxu1 %v3964_v13 }
 0x195   :  { %1767 = vmatpush1.bf16.msra.mxu0 %v3379_v25  ;;  %1808 = vmatpush1.bf16.msra.mxu1 %v3471_v42 }
 0x196   :  { %1768 = vmatprep.subr.bf16.mxu0 %v3386_v26  ;;  %1809 = vmatprep.subr.bf16.mxu1 %v3475_v43 }
 0x199   :  { %1769 = vmatpush1.bf16.msra.mxu0 %v3394_v28  ;;  %1810 = vmatpush1.bf16.msra.mxu1 %v3480_v44 }
 0x19a   :  { %1770 = vmatprep.subr.bf16.mxu0 %v3401_v29  ;;  %1811 = vmatprep.subr.bf16.mxu1 %v3483_v45 }
 0x19d   :  { %1771 = vmatpush1.bf16.msra.mxu0 %v3409_v30  ;;  %1812 = vmatpush1.bf16.msra.mxu1 %v3488_v46 }
 0x19e   :  { %1772 = vmatprep.subr.bf16.mxu0 %v3416_v31  ;;  %1813 = vmatprep.subr.bf16.mxu1 %v3492_v47 }
 0x1a1   :  { %1773 = vmatpush1.bf16.msra.mxu0 %v3424_v32  ;;  %1814 = vmatpush1.bf16.msra.mxu1 %v3497_v48 }
 0x1a2   :  { %1774 = vmatprep.subr.bf16.mxu0 %v3431_v33  ;;  %1815 = vmatprep.subr.bf16.mxu1 %v3501_v49 }
 0x1a5   :  { %1775 = vmatpush1.bf16.msra.mxu0 %v3438_v34  ;;  %1816 = vmatpush1.bf16.msra.mxu1 %v3505_v50 }
 0x1a6   :  { %1776 = vmatprep.subr.bf16.mxu0 %v3444_v35  ;;  %1817 = vmatprep.subr.bf16.mxu1 %v3509_v51 }
 0x1a9   :  { %1777 = vmatpush1.bf16.msra.mxu0 %v3454_v37  ;;  %1818 = vmatpush1.bf16.msra.mxu1 %v3513_v52 }
 0x1aa   :  { %1778 = vmatprep.subr.bf16.mxu0 %v3460_v39  ;;  %1819 = vmatprep.subr.bf16.mxu1 %v3517_v53 }
 0x1ad   :  { %1779 = vmatpush1.bf16.msra.mxu0 %v3469_v41  ;;  %1820 = vmatpush1.bf16.msra.mxu1 %v3521_v54 }
 0x1ae   :  { %1879 = vmatprep.subr.bf16.mxu0 %v3352_v20  ;;  %1920 = vmatprep.subr.bf16.mxu1 %v3447_v36 }
 0x263   :  { %v1683_v3 = vpop.f32.mrb[16].mxu0  ;;  %v1724_v16 = vpop.f32.mrb[28].mxu1 }
 0x264   :  { %v1731_v60 = vadd.f32 %v1683_v3, %v3580_v15  ;;  %v1733_v61 = vadd.f32 %v1724_v16, %v3591_v59  ;;  %v1685_v62 = vpop.f32.mrb[17].mxu0  ;;  %v1726_v1 = vpop.f32.mrb[29].mxu1 }
 0x265   :  { %v1732_v58 = vadd.f32 %v1685_v62, %v3586_v19  ;;  %v1734_v56 = vadd.f32 %v1726_v1, %v3596_v9  ;;  %v1687_v8 = vpop.f32.mrb[18].mxu0  ;;  %v1728_v17 = vpop.f32.mrb[30].mxu1 }
 0x266   :  { %v2643_v4 = vmul.f32 -1.442695, %v1731_v60  ;;  %v1688_v10 = vpop.f32.mrb[19].mxu0  ;;  %v1729_v12 = vpop.f32.mrb[31].mxu1  ;;  %v2645_v6 = vmul.f32 -1.442695, %v1733_v61 }
 0x267   :  { %v2644_v63 = vmul.f32 -1.442695, %v1732_v58 }
 0x268   :  { %2917 = vpow2.f32 %v2643_v4 }
 0x269   :  { %2919 = vpow2.f32 %v2644_v63 }
 0x26a   :  { %2921 = vtanh.f32 %v1734_v56 }
 0x26b   :  { %2923 = vpow2.f32 %v2645_v6 }
 0x272   :  { %v2918_v5 = vpop.eup %2917 }
 0x273   :  { %v1744_v21 = vadd.f32 1.0, %v2918_v5  ;;  %v2920_v15 = vpop.eup %2919 }
 0x274   :  { %v1745_v59 = vadd.f32 1.0, %v2920_v15  ;;  %v2922_v19 = vpop.eup %2921 }
 0x275   :  { %2925 = vrcp.f32 %v1744_v21  ;;  %v2924_v7 = vpop.eup %2923 }
 0x276   :  { %2927 = vrcp.f32 %v1745_v59  ;;  %v1746_v14 = vadd.f32 1.0, %v2924_v7 }
 0x278   :  { %2929 = vrcp.f32 %v1746_v14 }
 0x27f   :  { %v2926_v9 = vpop.eup %2925 }
 0x280   :  { %v1755_v55 = vmul.f32 %v2926_v9, %v2922_v19  ;;  %v2928_v11 = vpop.eup %2927 }
 0x281   :  { %v1754_v3 = vmul.f32 %v2928_v11, %v3643_v22 }
 0x282   :  { %v2930_v60 = vpop.eup %2929 }
 0x283   :  { %v3685_v16 = vadd.f32 %v1755_v55, %v1754_v3 }
 0x285   :  { %2931 = vtanh.f32 %v3685_v16 }
 0x28f   :  { %v2932_v61 = vpop.eup %2931 }
 0x290   :  { %v1758_v62 = vmul.f32 %v2932_v61, %v2930_v60 }
 0x292   :  { %v1763_v1 = vpack.c.bf16 %v1758_v62, %v1758_v62 }
 0x294   :  { %1797 = vmatmul.mubr.bf16.vlgmr.msra.gmra.mrb[20].mxu0 %v1763_v1  ;;  %1838 = vmatmul.mubr.bf16.vlgmr.msra.gmra.mrb[32].mxu1 %v1763_v1 }
 0x295   :  { %1880 = vmatpush1.bf16.msra.mxu0 %v3362_v23  ;;  %1921 = vmatpush1.bf16.msra.mxu1 %v3456_v38 }
 0x296   :  { %1881 = vmatprep.subr.bf16.mxu0 %v3370_v24  ;;  %1922 = vmatprep.subr.bf16.mxu1 %v3462_v40 }
 0x297   :  { %1911 = vmatprep.mubr.bf16.mxu0 %v3964_v13  ;;  %1952 = vmatprep.mubr.bf16.mxu1 %v3964_v13 }
 0x299   :  { %1882 = vmatpush1.bf16.msra.mxu0 %v3379_v25  ;;  %1923 = vmatpush1.bf16.msra.mxu1 %v3471_v42 }
 0x29a   :  { %1883 = vmatprep.subr.bf16.mxu0 %v3386_v26  ;;  %1924 = vmatprep.subr.bf16.mxu1 %v3475_v43 }
 0x29d   :  { %1884 = vmatpush1.bf16.msra.mxu0 %v3394_v28  ;;  %1925 = vmatpush1.bf16.msra.mxu1 %v3480_v44 }
 0x29e   :  { %1885 = vmatprep.subr.bf16.mxu0 %v3401_v29  ;;  %1926 = vmatprep.subr.bf16.mxu1 %v3483_v45 }
 0x2a1   :  { %1886 = vmatpush1.bf16.msra.mxu0 %v3409_v30  ;;  %1927 = vmatpush1.bf16.msra.mxu1 %v3488_v46 }
 0x2a2   :  { %1887 = vmatprep.subr.bf16.mxu0 %v3416_v31  ;;  %1928 = vmatprep.subr.bf16.mxu1 %v3492_v47 }
 0x2a5   :  { %1888 = vmatpush1.bf16.msra.mxu0 %v3424_v32  ;;  %1929 = vmatpush1.bf16.msra.mxu1 %v3497_v48 }
 0x2a6   :  { %1889 = vmatprep.subr.bf16.mxu0 %v3431_v33  ;;  %1930 = vmatprep.subr.bf16.mxu1 %v3501_v49 }
 0x2a9   :  { %1890 = vmatpush1.bf16.msra.mxu0 %v3438_v34  ;;  %1931 = vmatpush1.bf16.msra.mxu1 %v3505_v50 }
 0x2aa   :  { %1891 = vmatprep.subr.bf16.mxu0 %v3444_v35  ;;  %1932 = vmatprep.subr.bf16.mxu1 %v3509_v51 }
 0x2ad   :  { %1892 = vmatpush1.bf16.msra.mxu0 %v3454_v37  ;;  %1933 = vmatpush1.bf16.msra.mxu1 %v3513_v52 }
 0x2ae   :  { %1893 = vmatprep.subr.bf16.mxu0 %v3460_v39  ;;  %1934 = vmatprep.subr.bf16.mxu1 %v3517_v53 }
 0x2b1   :  { %1894 = vmatpush1.bf16.msra.mxu0 %v3469_v41  ;;  %1935 = vmatpush1.bf16.msra.mxu1 %v3521_v54 }
 0x2b2   :  { %1994 = vmatprep.subr.bf16.mxu0 %v3352_v20  ;;  %2035 = vmatprep.subr.bf16.mxu1 %v3447_v36 }
 0x367   :  { %v1798_v22 = vpop.f32.mrb[20].mxu0  ;;  %v1839_v58 = vpop.f32.mrb[32].mxu1 }
 0x368   :  { %v1846_v56 = vadd.f32 %v1798_v22, %v3602_v18  ;;  %v1848_v8 = vadd.f32 %v1839_v58, %v3613_v0  ;;  %v1800_v17 = vpop.f32.mrb[21].mxu0  ;;  %v1841_v4 = vpop.f32.mrb[33].mxu1 }
 0x369   :  { %v1847_v10 = vadd.f32 %v1800_v17, %v3608_v57  ;;  %v1849_v12 = vadd.f32 %v1841_v4, %v3615_v27  ;;  %v1802_v63 = vpop.f32.mrb[22].mxu0  ;;  %v1843_v6 = vpop.f32.mrb[34].mxu1  ;;  %v3965_v17 = vld [vmem:[#allocation25_spill] sm:$0xff] }
 0x36a   :  { %v2646_v5 = vmul.f32 -1.442695, %v1846_v56  ;;  %v1803_v21 = vpop.f32.mrb[23].mxu0  ;;  %v1844_v15 = vpop.f32.mrb[35].mxu1  ;;  %v2648_v19 = vmul.f32 -1.442695, %v1848_v8 }
 0x36b   :  { %v2647_v59 = vmul.f32 -1.442695, %v1847_v10  ;;  %v3966_v63 = vld [vmem:[#allocation16_spill] sm:$0xff] }
 0x36c   :  { %2933 = vpow2.f32 %v2646_v5  ;;  %v3967_v5 = vld [vmem:[#allocation26_spill] sm:$0xff] }
 0x36d   :  { %2935 = vpow2.f32 %v2647_v59 }
 0x36e   :  { %2937 = vtanh.f32 %v1849_v12 }
 0x36f   :  { %2939 = vpow2.f32 %v2648_v19 }
 0x376   :  { %v2934_v7 = vpop.eup %2933 }
 0x377   :  { %v1859_v9 = vadd.f32 1.0, %v2934_v7  ;;  %v2936_v18 = vpop.eup %2935 }
 0x378   :  { %v1860_v0 = vadd.f32 1.0, %v2936_v18  ;;  %v2938_v57 = vpop.eup %2937 }
 0x379   :  { %2941 = vrcp.f32 %v1859_v9  ;;  %v2940_v55 = vpop.eup %2939 }
 0x37a   :  { %2943 = vrcp.f32 %v1860_v0  ;;  %v1861_v3 = vadd.f32 1.0, %v2940_v55 }
 0x37c   :  { %2945 = vrcp.f32 %v1861_v3 }
 0x383   :  { %v2942_v27 = vpop.eup %2941 }
 0x384   :  { %v1870_v11 = vmul.f32 %v2942_v27, %v2938_v57  ;;  %v2944_v14 = vpop.eup %2943 }
 0x385   :  { %v1869_v60 = vmul.f32 %v2944_v14, %v3685_v16 }
 0x386   :  { %v2946_v62 = vpop.eup %2945 }
 0x387   :  { %v3727_v61 = vadd.f32 %v1870_v11, %v1869_v60 }
 0x389   :  { %2947 = vtanh.f32 %v3727_v61 }
 0x393   :  { %v2948_v1 = vpop.eup %2947 }
 0x394   :  { %v1873_v22 = vmul.f32 %v2948_v1, %v2946_v62 }
 0x396   :  { %v1878_v58 = vpack.c.bf16 %v1873_v22, %v1873_v22 }
 0x398   :  { %1912 = vmatmul.mubr.bf16.vlgmr.msra.gmra.mrb[24].mxu0 %v1878_v58  ;;  %1953 = vmatmul.mubr.bf16.vlgmr.msra.gmra.mrb[36].mxu1 %v1878_v58 }
 0x399   :  { %1995 = vmatpush1.bf16.msra.mxu0 %v3362_v23  ;;  %2036 = vmatpush1.bf16.msra.mxu1 %v3456_v38 }
 0x39a   :  { %1996 = vmatprep.subr.bf16.mxu0 %v3370_v24  ;;  %2037 = vmatprep.subr.bf16.mxu1 %v3462_v40 }
 0x39b   :  { %2026 = vmatprep.mubr.bf16.mxu0 %v3964_v13  ;;  %2067 = vmatprep.mubr.bf16.mxu1 %v3964_v13 }
 0x39d   :  { %1997 = vmatpush1.bf16.msra.mxu0 %v3379_v25  ;;  %2038 = vmatpush1.bf16.msra.mxu1 %v3471_v42 }
 0x39e   :  { %1998 = vmatprep.subr.bf16.mxu0 %v3386_v26  ;;  %2039 = vmatprep.subr.bf16.mxu1 %v3475_v43 }
 0x3a1   :  { %1999 = vmatpush1.bf16.msra.mxu0 %v3394_v28  ;;  %2040 = vmatpush1.bf16.msra.mxu1 %v3480_v44 }
 0x3a2   :  { %2000 = vmatprep.subr.bf16.mxu0 %v3401_v29  ;;  %2041 = vmatprep.subr.bf16.mxu1 %v3483_v45 }
 0x3a5   :  { %2001 = vmatpush1.bf16.msra.mxu0 %v3409_v30  ;;  %2042 = vmatpush1.bf16.msra.mxu1 %v3488_v46 }
 0x3a6   :  { %2002 = vmatprep.subr.bf16.mxu0 %v3416_v31  ;;  %2043 = vmatprep.subr.bf16.mxu1 %v3492_v47 }
 0x3a9   :  { %2003 = vmatpush1.bf16.msra.mxu0 %v3424_v32  ;;  %2044 = vmatpush1.bf16.msra.mxu1 %v3497_v48 }
 0x3aa   :  { %2004 = vmatprep.subr.bf16.mxu0 %v3431_v33  ;;  %2045 = vmatprep.subr.bf16.mxu1 %v3501_v49 }
 0x3ad   :  { %2005 = vmatpush1.bf16.msra.mxu0 %v3438_v34  ;;  %2046 = vmatpush1.bf16.msra.mxu1 %v3505_v50 }
 0x3ae   :  { %2006 = vmatprep.subr.bf16.mxu0 %v3444_v35  ;;  %2047 = vmatprep.subr.bf16.mxu1 %v3509_v51 }
 0x3b1   :  { %2007 = vmatpush1.bf16.msra.mxu0 %v3454_v37  ;;  %2048 = vmatpush1.bf16.msra.mxu1 %v3513_v52 }
 0x3b2   :  { %2008 = vmatprep.subr.bf16.mxu0 %v3460_v39  ;;  %2049 = vmatprep.subr.bf16.mxu1 %v3517_v53 }
 0x3b5   :  { %2009 = vmatpush1.bf16.msra.mxu0 %v3469_v41  ;;  %2050 = vmatpush1.bf16.msra.mxu1 %v3521_v54 }
 0x3b6   :  { %2109 = vmatprep.subr.bf16.mxu0 %v3352_v20  ;;  %2150 = vmatprep.subr.bf16.mxu1 %v3447_v36 }
 0x46b   :  { %v1913_v16 = vpop.f32.mrb[24].mxu0  ;;  %v1954_v56 = vpop.f32.mrb[36].mxu1 }
 0x46c   :  { %v1961_v8 = vadd.f32 %v1913_v16, %v3564_v2  ;;  %v1963_v4 = vadd.f32 %v1954_v56, %v3965_v17  ;;  %v1915_v10 = vpop.f32.mrb[25].mxu0  ;;  %v1956_v12 = vpop.f32.mrb[37].mxu1 }
 0x46d   :  { %v1962_v6 = vadd.f32 %v1915_v10, %v3966_v63  ;;  %v1964_v21 = vadd.f32 %v1956_v12, %v3967_v5  ;;  %v1917_v15 = vpop.f32.mrb[26].mxu0  ;;  %v1958_v59 = vpop.f32.mrb[38].mxu1 }
 0x46e   :  { %v2649_v19 = vmul.f32 -1.442695, %v1961_v8  ;;  %v1918_v7 = vpop.f32.mrb[27].mxu0  ;;  %v1959_v9 = vpop.f32.mrb[39].mxu1  ;;  %v2651_v18 = vmul.f32 -1.442695, %v1963_v4 }
 0x46f   :  { %v2650_v20 = vmul.f32 -1.442695, %v1962_v6 }
 0x470   :  { %2949 = vpow2.f32 %v2649_v19 }
 0x471   :  { %2951 = vpow2.f32 %v2650_v20 }
 0x472   :  { %2953 = vtanh.f32 %v1964_v21 }
 0x473   :  { %2955 = vpow2.f32 %v2651_v18 }
 0x47a   :  { %v2950_v0 = vpop.eup %2949 }
 0x47b   :  { %v1974_v57 = vadd.f32 1.0, %v2950_v0  ;;  %v2952_v2 = vpop.eup %2951 }
 0x47c   :  { %v1975_v55 = vadd.f32 1.0, %v2952_v2  ;;  %v2954_v27 = vpop.eup %2953 }
 0x47d   :  { %2957 = vrcp.f32 %v1974_v57  ;;  %v2956_v11 = vpop.eup %2955 }
 0x47e   :  { %2959 = vrcp.f32 %v1975_v55  ;;  %v1976_v62 = vadd.f32 1.0, %v2956_v11  ;;  %v3820_v11 = vld [vmem:[#allocation8 + $0x24] ss:$16 sps:$4 sm:$0xff]  }
 0x480   :  { %2961 = vrcp.f32 %v1976_v62 }
 0x487   :  { %v2958_v14 = vpop.eup %2957 }
 0x488   :  { %v1985_v3 = vmul.f32 %v2958_v14, %v2954_v27  ;;  %v2960_v60 = vpop.eup %2959  ;;  %v3816_v27 = vld [vmem:[#allocation8] ss:$16 sps:$4 sm:$0xff]  }
 0x489   :  { %v1984_v1 = vmul.f32 %v2960_v60, %v3727_v61  ;;  %v3826_v14 = vld [vmem:[#allocation8 + $0x20] ss:$16 sps:$4 sm:$0xff]  }
 0x48a   :  { %v2962_v58 = vpop.eup %2961  ;;  %v3842_v60 = vld [vmem:[#allocation8 + $0x60] ss:$16 sps:$4 sm:$0xff]  }
 0x48b   :  { %v3769_v22 = vadd.f32 %v1985_v3, %v1984_v1  ;;  %v3830_v3 = vld [vmem:[#allocation8 + $0x44] ss:$16 sps:$4 sm:$0xff]  }
 0x48c   :  { %v3972_v1 = vld [vmem:[#allocation19_spill] sm:$0xff] }
 0x48d   :  { %2963 = vtanh.f32 %v3769_v22 }
 0x497   :  { %v2964_v16 = vpop.eup %2963 }
 0x498   :  { %v1988_v56 = vmul.f32 %v2964_v16, %v2962_v58 }
 0x49a   :  { %v1993_v8 = vpack.c.bf16 %v1988_v56, %v1988_v56 }
 0x49c   :  { %2027 = vmatmul.mubr.bf16.vlgmr.msra.gmra.mrb[28].mxu0 %v1993_v8  ;;  %2068 = vmatmul.mubr.bf16.vlgmr.msra.gmra.mrb[40].mxu1 %v1993_v8  ;;  %v3974_v8 = vld [vmem:[#allocation20_spill] sm:$0xff] }
 0x49d   :  { %2110 = vmatpush1.bf16.msra.mxu0 %v3362_v23  ;;  %2151 = vmatpush1.bf16.msra.mxu1 %v3456_v38  ;;  %v3804_v23 = vld [vmem:[#allocation8 + $0x4] ss:$16 sps:$4 sm:$0xff]  }
 0x49e   :  { %2111 = vmatprep.subr.bf16.mxu0 %v3370_v24  ;;  %2152 = vmatprep.subr.bf16.mxu1 %v3462_v40 }
 0x49f   :  { %2141 = vmatprep.mubr.bf16.mxu0 %v3964_v13  ;;  %2182 = vmatprep.mubr.bf16.mxu1 %v3964_v13 }
 0x4a1   :  { %2112 = vmatpush1.bf16.msra.mxu0 %v3379_v25  ;;  %2153 = vmatpush1.bf16.msra.mxu1 %v3471_v42 }
 0x4a2   :  { %2113 = vmatprep.subr.bf16.mxu0 %v3386_v26  ;;  %2154 = vmatprep.subr.bf16.mxu1 %v3475_v43  ;;  %v3968_v26 = vld [vmem:[#allocation17_spill] sm:$0xff] }
 0x4a5   :  { %2114 = vmatpush1.bf16.msra.mxu0 %v3394_v28  ;;  %2155 = vmatpush1.bf16.msra.mxu1 %v3480_v44 }
 0x4a6   :  { %2115 = vmatprep.subr.bf16.mxu0 %v3401_v29  ;;  %2156 = vmatprep.subr.bf16.mxu1 %v3483_v45  ;;  %v3969_v29 = vld [vmem:[#allocation27_spill] sm:$0xff] }
 0x4a9   :  { %2116 = vmatpush1.bf16.msra.mxu0 %v3409_v30  ;;  %2157 = vmatpush1.bf16.msra.mxu1 %v3488_v46 }
 0x4aa   :  { %2117 = vmatprep.subr.bf16.mxu0 %v3416_v31  ;;  %2158 = vmatprep.subr.bf16.mxu1 %v3492_v47 }
 0x4ad   :  { %2118 = vmatpush1.bf16.msra.mxu0 %v3424_v32  ;;  %2159 = vmatpush1.bf16.msra.mxu1 %v3497_v48 }
 0x4ae   :  { %2119 = vmatprep.subr.bf16.mxu0 %v3431_v33  ;;  %2160 = vmatprep.subr.bf16.mxu1 %v3501_v49  ;;  %v3970_v33 = vld [vmem:[#allocation18_spill] sm:$0xff] }
 0x4b1   :  { %2120 = vmatpush1.bf16.msra.mxu0 %v3438_v34  ;;  %2161 = vmatpush1.bf16.msra.mxu1 %v3505_v50 }
 0x4b2   :  { %2121 = vmatprep.subr.bf16.mxu0 %v3444_v35  ;;  %2162 = vmatprep.subr.bf16.mxu1 %v3509_v51  ;;  %v3971_v35 = vld [vmem:[#allocation28_spill] sm:$0xff] }
 0x4b5   :  { %2122 = vmatpush1.bf16.msra.mxu0 %v3454_v37  ;;  %2163 = vmatpush1.bf16.msra.mxu1 %v3513_v52 }
 0x4b6   :  { %2123 = vmatprep.subr.bf16.mxu0 %v3460_v39  ;;  %2164 = vmatprep.subr.bf16.mxu1 %v3517_v53 }
 0x4b9   :  { %2124 = vmatpush1.bf16.msra.mxu0 %v3469_v41  ;;  %2165 = vmatpush1.bf16.msra.mxu1 %v3521_v54 }
 0x4ba   :  { %2224 = vmatprep.subr.bf16.mxu0 %v3804_v23  ;;  %2265 = vmatprep.subr.bf16.mxu1 %v3447_v36 }
 0x56f   :  { %v2028_v24 = vpop.f32.mrb[28].mxu0  ;;  %v2069_v25 = vpop.f32.mrb[40].mxu1 }
 0x570   :  { %v2076_v28 = vadd.f32 %v2028_v24, %v3968_v26  ;;  %v2078_v30 = vadd.f32 %v2069_v25, %v3969_v29  ;;  %v2030_v31 = vpop.f32.mrb[29].mxu0  ;;  %v2071_v32 = vpop.f32.mrb[41].mxu1  ;;  %v3975_v24 = vld [vmem:[#allocation30_spill] sm:$0xff] }
 0x571   :  { %v2077_v34 = vadd.f32 %v2030_v31, %v3970_v33  ;;  %v2079_v37 = vadd.f32 %v2071_v32, %v3971_v35  ;;  %v2032_v39 = vpop.f32.mrb[30].mxu0  ;;  %v2073_v41 = vpop.f32.mrb[42].mxu1 }
 0x572   :  { %v2652_v61 = vmul.f32 -1.442695, %v2076_v28  ;;  %v2033_v17 = vpop.f32.mrb[31].mxu0  ;;  %v2074_v4 = vpop.f32.mrb[43].mxu1  ;;  %v2654_v36 = vmul.f32 -1.442695, %v2078_v30 }
 0x573   :  { %v2653_v10 = vmul.f32 -1.442695, %v2077_v34 }
 0x574   :  { %2965 = vpow2.f32 %v2652_v61 }
 0x575   :  { %2967 = vpow2.f32 %v2653_v10 }
 0x576   :  { %2969 = vtanh.f32 %v2079_v37 }
 0x577   :  { %2971 = vpow2.f32 %v2654_v36 }
 0x57e   :  { %v2966_v12 = vpop.eup %2965 }
 0x57f   :  { %v2089_v63 = vadd.f32 1.0, %v2966_v12  ;;  %v2968_v6 = vpop.eup %2967 }
 0x580   :  { %v2090_v5 = vadd.f32 1.0, %v2968_v6  ;;  %v2970_v21 = vpop.eup %2969 }
 0x581   :  { %2973 = vrcp.f32 %v2089_v63  ;;  %v2972_v15 = vpop.eup %2971 }
 0x582   :  { %2975 = vrcp.f32 %v2090_v5  ;;  %v2091_v9 = vadd.f32 1.0, %v2972_v15  ;;  %v3047_v15 = vld [vmem:[#allocation8 + $0x2c] ss:$16 sps:$4 sm:$0xff]  }
 0x584   :  { %2977 = vrcp.f32 %v2091_v9  ;;  %v3051_v9 = vld [vmem:[#allocation8 + $0x6c] ss:$16 sps:$4 sm:$0xff]  }
 0x58b   :  { %v2974_v59 = vpop.eup %2973 }
 0x58c   :  { %v2100_v19 = vmul.f32 %v2974_v59, %v2970_v21  ;;  %v2976_v7 = vpop.eup %2975  ;;  %v3046_v21 = vld [vmem:[#allocation8 + $0x8] ss:$16 sps:$4 sm:$0xff]  }
 0x58d   :  { %v2099_v20 = vmul.f32 %v2976_v7, %v3769_v22  ;;  %v3973_v22 = vld [vmem:[#allocation29_spill] sm:$0xff]  ;;  %v3048_v59 = vld [vmem:[#allocation8 + $0x28] ss:$16 sps:$4 sm:$0xff]  }
 0x58e   :  { %v2978_v0 = vpop.eup %2977  ;;  %v3050_v7 = vld [vmem:[#allocation8 + $0x48] ss:$16 sps:$4 sm:$0xff]  }
 0x58f   :  { %v3813_v18 = vadd.f32 %v2100_v19, %v2099_v20  ;;  %v3049_v19 = vld [vmem:[#allocation8 + $0x4c] ss:$16 sps:$4 sm:$0xff]   ;;  %v3052_v20 = vld [vmem:[#allocation8 + $0x68] ss:$16 sps:$4 sm:$0xff]  }
 0x591   :  { %2979 = vtanh.f32 %v3813_v18 }
 0x59b   :  { %v2980_v57 = vpop.eup %2979 }
 0x59c   :  { %v2103_v2 = vmul.f32 %v2980_v57, %v2978_v0  ;;  %v3055_v0 = vld [vmem:[#allocation8 + $0xac] ss:$16 sps:$4 sm:$0xff]   ;;  %v3056_v57 = vld [vmem:[#allocation8 + $0xa8] ss:$16 sps:$4 sm:$0xff]  }
 0x59e   :  { %v2108_v55 = vpack.c.bf16 %v2103_v2, %v2103_v2  ;;  %v3057_v2 = vld [vmem:[#allocation8 + $0xcc] ss:$16 sps:$4 sm:$0xff]  }
 0x5a0   :  { %2142 = vmatmul.mubr.bf16.vlgmr.msra.gmra.mrb[32].mxu0 %v2108_v55  ;;  %2183 = vmatmul.mubr.bf16.vlgmr.msra.gmra.mrb[44].mxu1 %v2108_v55  ;;  %v3058_v55 = vld [vmem:[#allocation8 + $0xc8] ss:$16 sps:$4 sm:$0xff]  }
 0x5a1   :  { %2225 = vmatpush1.bf16.msra.mxu0 %v3816_v27  ;;  %2266 = vmatpush1.bf16.msra.mxu1 %v3456_v38  ;;  %v3834_v38 = vld [vmem:[#allocation8 + $0x40] ss:$16 sps:$4 sm:$0xff]  }
 0x5a2   :  { %2226 = vmatprep.subr.bf16.mxu0 %v3820_v11  ;;  %2267 = vmatprep.subr.bf16.mxu1 %v3462_v40  ;;  %v3838_v40 = vld [vmem:[#allocation8 + $0x64] ss:$16 sps:$4 sm:$0xff]  }
 0x5a3   :  { %2256 = vmatprep.mubr.bf16.mxu0 %v3964_v13  ;;  %2297 = vmatprep.mubr.bf16.mxu1 %v3964_v13 }
 0x5a5   :  { %2227 = vmatpush1.bf16.msra.mxu0 %v3826_v14  ;;  %2268 = vmatpush1.bf16.msra.mxu1 %v3471_v42  ;;  %v3846_v42 = vld [vmem:[#allocation8 + $0x84] ss:$16 sps:$4 sm:$0xff]  }
 0x5a6   :  { %2228 = vmatprep.subr.bf16.mxu0 %v3830_v3  ;;  %2269 = vmatprep.subr.bf16.mxu1 %v3475_v43  ;;  %v3850_v43 = vld [vmem:[#allocation8 + $0x80] ss:$16 sps:$4 sm:$0xff]  }
 0x5a9   :  { %2229 = vmatpush1.bf16.msra.mxu0 %v3834_v38  ;;  %2270 = vmatpush1.bf16.msra.mxu1 %v3480_v44  ;;  %v3854_v44 = vld [vmem:[#allocation8 + $0xa4] ss:$16 sps:$4 sm:$0xff]  }
 0x5aa   :  { %2230 = vmatprep.subr.bf16.mxu0 %v3838_v40  ;;  %2271 = vmatprep.subr.bf16.mxu1 %v3483_v45  ;;  %v3858_v45 = vld [vmem:[#allocation8 + $0xa0] ss:$16 sps:$4 sm:$0xff]  }
 0x5ad   :  { %2231 = vmatpush1.bf16.msra.mxu0 %v3842_v60  ;;  %2272 = vmatpush1.bf16.msra.mxu1 %v3488_v46  ;;  %v3862_v46 = vld [vmem:[#allocation8 + $0xc4] ss:$16 sps:$4 sm:$0xff]  }
 0x5ae   :  { %2232 = vmatprep.subr.bf16.mxu0 %v3846_v42  ;;  %2273 = vmatprep.subr.bf16.mxu1 %v3492_v47  ;;  %v3866_v47 = vld [vmem:[#allocation8 + $0xc0] ss:$16 sps:$4 sm:$0xff]  }
 0x5b1   :  { %2233 = vmatpush1.bf16.msra.mxu0 %v3850_v43  ;;  %2274 = vmatpush1.bf16.msra.mxu1 %v3497_v48  ;;  %v3870_v48 = vld [vmem:[#allocation8 + $0xe4] ss:$16 sps:$4 sm:$0xff]  }
 0x5b2   :  { %2234 = vmatprep.subr.bf16.mxu0 %v3854_v44  ;;  %2275 = vmatprep.subr.bf16.mxu1 %v3501_v49  ;;  %v3874_v49 = vld [vmem:[#allocation8 + $0xe0] ss:$16 sps:$4 sm:$0xff]  }
 0x5b5   :  { %2235 = vmatpush1.bf16.msra.mxu0 %v3858_v45  ;;  %2276 = vmatpush1.bf16.msra.mxu1 %v3505_v50  ;;  %v3045_v50 = vld [vmem:[#allocation8 + $0xc] ss:$16 sps:$4 sm:$0xff]  }
 0x5b6   :  { %2236 = vmatprep.subr.bf16.mxu0 %v3862_v46  ;;  %2277 = vmatprep.subr.bf16.mxu1 %v3509_v51 }
 0x5b9   :  { %2237 = vmatpush1.bf16.msra.mxu0 %v3866_v47  ;;  %2278 = vmatpush1.bf16.msra.mxu1 %v3513_v52 }
 0x5ba   :  { %2238 = vmatprep.subr.bf16.mxu0 %v3870_v48  ;;  %2279 = vmatprep.subr.bf16.mxu1 %v3517_v53 }
 0x5bd   :  { %2239 = vmatpush1.bf16.msra.mxu0 %v3874_v49  ;;  %2280 = vmatpush1.bf16.msra.mxu1 %v3521_v54 }
 0x5be   :  { %2339 = vmatprep.subr.bf16.mxu0 %v3804_v23  ;;  %2380 = vmatprep.subr.bf16.mxu1 %v3045_v50 }
 0x673   :  { %v2143_v51 = vpop.f32.mrb[32].mxu0  ;;  %v2184_v62 = vpop.f32.mrb[44].mxu1 }
 0x674   :  { %v2191_v52 = vadd.f32 %v2143_v51, %v3972_v1  ;;  %v2193_v58 = vadd.f32 %v2184_v62, %v3973_v22  ;;  %v2145_v16 = vpop.f32.mrb[33].mxu0  ;;  %v2186_v56 = vpop.f32.mrb[45].mxu1 }
 0x675   :  { %v2192_v53 = vadd.f32 %v2145_v16, %v3974_v8  ;;  %v2194_v25 = vadd.f32 %v2186_v56, %v3975_v24  ;;  %v2147_v26 = vpop.f32.mrb[34].mxu0  ;;  %v2188_v28 = vpop.f32.mrb[46].mxu1 }
 0x676   :  { %v2655_v29 = vmul.f32 -1.442695, %v2191_v52  ;;  %v2148_v54 = vpop.f32.mrb[35].mxu0  ;;  %v2189_v30 = vpop.f32.mrb[47].mxu1  ;;  %v2657_v31 = vmul.f32 -1.442695, %v2193_v58 }
 0x677   :  { %v2656_v23 = vmul.f32 -1.442695, %v2192_v53 }
 0x678   :  { %2981 = vpow2.f32 %v2655_v29 }
 0x679   :  { %2983 = vpow2.f32 %v2656_v23 }
 0x67a   :  { %2985 = vtanh.f32 %v2194_v25 }
 0x67b   :  { %2987 = vpow2.f32 %v2657_v31 }
 0x682   :  { %v2982_v32 = vpop.eup %2981 }
 0x683   :  { %v2204_v33 = vadd.f32 1.0, %v2982_v32  ;;  %v2984_v34 = vpop.eup %2983 }
 0x684   :  { %v2205_v35 = vadd.f32 1.0, %v2984_v34  ;;  %v2986_v37 = vpop.eup %2985  ;;  %v2449_v34 = vld [vmem:[#allocation9] sm:$0xff] }
 0x685   :  { %2989 = vrcp.f32 %v2204_v33  ;;  %v2988_v39 = vpop.eup %2987 }
 0x686   :  { %2991 = vrcp.f32 %v2205_v35  ;;  %v2206_v4 = vadd.f32 1.0, %v2988_v39  ;;  %v2450_v35 = vld [vmem:[#allocation9 + $0x8] sm:$0xff]  ;;  %v3192_v39 = vmov 0.0|0.0  }
 0x688   :  { %2993 = vrcp.f32 %v2206_v4  ;;  %v2453_v4 = vld [vmem:[#allocation9 + $0x20] sm:$0xff] }
 0x68f   :  { %v2990_v41 = vpop.eup %2989 }
 0x690   :  { %v2215_v61 = vmul.f32 %v2990_v41, %v2986_v37  ;;  %v2992_v17 = vpop.eup %2991  ;;  %v2814_v37 = vpack.c.bf16 %v2450_v35, %v2449_v34  ;;  %v2451_v41 = vld [vmem:[#allocation9 + $0x10] sm:$0xff] }
 0x691   :  { %v2214_v10 = vmul.f32 %v2992_v17, %v3813_v18  ;;  %v3054_v18 = vld [vmem:[#allocation8 + $0x88] ss:$16 sps:$4 sm:$0xff]  }
 0x692   :  { %v2994_v12 = vpop.eup %2993 }
 0x693   :  { %v3884_v36 = vadd.f32 %v2215_v61, %v2214_v10  ;;  %v2452_v61 = vld [vmem:[#allocation9 + $0x18] sm:$0xff]  ;;  %v2454_v10 = vld [vmem:[#allocation9 + $0x28] sm:$0xff] }
 0x694   :  { %v2817_v17 = vpack.c.bf16 %v2452_v61, %v2451_v41 }
 0x695   :  { %2995 = vtanh.f32 %v3884_v36 }
 0x69f   :  { %v2996_v63 = vpop.eup %2995 }
 0x6a0   :  { %v2218_v6 = vmul.f32 %v2996_v63, %v2994_v12  ;;  %v2455_v12 = vld [vmem:[#allocation9 + $0x30] sm:$0xff]  ;;  %v2456_v63 = vld [vmem:[#allocation9 + $0x38] sm:$0xff] }
 0x6a2   :  { %v2223_v5 = vpack.c.bf16 %v2218_v6, %v2218_v6  ;;  %v2823_v6 = vpack.c.bf16 %v2456_v63, %v2455_v12 }
 0x6a4   :  { %2257 = vmatmul.mubr.bf16.vlgmr.msra.gmra.mrb[36].mxu0 %v2223_v5  ;;  %2298 = vmatmul.mubr.bf16.vlgmr.msra.gmra.mrb[48].mxu1 %v2223_v5  ;;  %v2457_v5 = vld [vmem:[#allocation9 + $0x40] sm:$0xff] }
 0x6a5   :  { %2340 = vmatpush1.bf16.msra.mxu0 %v3816_v27  ;;  %2381 = vmatpush1.bf16.msra.mxu1 %v3046_v21  ;;  %v3059_v27 = vld [vmem:[#allocation8 + $0xec] ss:$16 sps:$4 sm:$0xff]  }
 0x6a6   :  { %2341 = vmatprep.subr.bf16.mxu0 %v3820_v11  ;;  %2382 = vmatprep.subr.bf16.mxu1 %v3047_v15  ;;  %v3060_v11 = vld [vmem:[#allocation8 + $0xe8] ss:$16 sps:$4 sm:$0xff]  }
 0x6a7   :  { %2371 = vmatprep.mubr.bf16.mxu0 %v3964_v13  ;;  %2412 = vmatprep.mubr.bf16.mxu1 %v3964_v13  ;;  %v3053_v13 = vld [vmem:[#allocation8 + $0x8c] ss:$16 sps:$4 sm:$0xff]  }
 0x6a8   :  { %v2458_v21 = vld [vmem:[#allocation9 + $0x48] sm:$0xff] }
 0x6a9   :  { %2342 = vmatpush1.bf16.msra.mxu0 %v3826_v14  ;;  %2383 = vmatpush1.bf16.msra.mxu1 %v3048_v59  ;;  %v2826_v15 = vpack.c.bf16 %v2458_v21, %v2457_v5  ;;  %v2459_v59 = vld [vmem:[#allocation9 + $0x50] sm:$0xff] }
 0x6aa   :  { %2343 = vmatprep.subr.bf16.mxu0 %v3830_v3  ;;  %2384 = vmatprep.subr.bf16.mxu1 %v3049_v19  ;;  %v2460_v19 = vld [vmem:[#allocation9 + $0x58] sm:$0xff] }
 0x6ad   :  { %2344 = vmatpush1.bf16.msra.mxu0 %v3834_v38  ;;  %2385 = vmatpush1.bf16.msra.mxu1 %v3050_v7  ;;  %v3976_v38 = vld [vmem:[#allocation21_spill] sm:$0xff]  ;;  %v2829_v7 = vpack.c.bf16 %v2460_v19, %v2459_v59 }
 0x6ae   :  { %2345 = vmatprep.subr.bf16.mxu0 %v3838_v40  ;;  %2386 = vmatprep.subr.bf16.mxu1 %v3051_v9  ;;  %v2461_v9 = vld [vmem:[#allocation9 + $0x60] sm:$0xff] }
 0x6b1   :  { %2346 = vmatpush1.bf16.msra.mxu0 %v3842_v60  ;;  %2387 = vmatpush1.bf16.msra.mxu1 %v3052_v20  ;;  %v3977_v60 = vld [vmem:[#allocation31_spill] sm:$0xff]  ;;  %v2462_v20 = vld [vmem:[#allocation9 + $0x68] sm:$0xff] }
 0x6b2   :  { %2347 = vmatprep.subr.bf16.mxu0 %v3846_v42  ;;  %2388 = vmatprep.subr.bf16.mxu1 %v3053_v13  ;;  %v3980_v13 = vmov 0.0  }
 0x6b5   :  { %2348 = vmatpush1.bf16.msra.mxu0 %v3850_v43  ;;  %2389 = vmatpush1.bf16.msra.mxu1 %v3054_v18  ;;  %v2832_v18 = vpack.c.bf16 %v2462_v20, %v2461_v9 }
 0x6b6   :  { %2349 = vmatprep.subr.bf16.mxu0 %v3854_v44  ;;  %2390 = vmatprep.subr.bf16.mxu1 %v3055_v0  ;;  %v2463_v0 = vld [vmem:[#allocation9 + $0x70] sm:$0xff] }
 0x6b9   :  { %2350 = vmatpush1.bf16.msra.mxu0 %v3858_v45  ;;  %2391 = vmatpush1.bf16.msra.mxu1 %v3056_v57  ;;  %v3978_v45 = vld [vmem:[#allocation22_spill] sm:$0xff] }
 0x6ba   :  { %2351 = vmatprep.subr.bf16.mxu0 %v3862_v46  ;;  %2392 = vmatprep.subr.bf16.mxu1 %v3057_v2  ;;  %v2464_v57 = vld [vmem:[#allocation9 + $0x78] sm:$0xff] }
 0x6bb   :  { %v2835_v2 = vpack.c.bf16 %v2464_v57, %v2463_v0 }
 0x6bd   :  { %2352 = vmatpush1.bf16.msra.mxu0 %v3866_v47  ;;  %2393 = vmatpush1.bf16.msra.mxu1 %v3058_v55  ;;  %v3979_v47 = vld [vmem:[#allocation32_spill] sm:$0xff] }
 0x6be   :  { %2353 = vmatprep.subr.bf16.mxu0 %v3870_v48  ;;  %2394 = vmatprep.subr.bf16.mxu1 %v3059_v27 }
 0x6c1   :  { %2354 = vmatpush1.bf16.msra.mxu0 %v3874_v49  ;;  %2395 = vmatpush1.bf16.msra.mxu1 %v3060_v11  ;;  %v3981_v11 = vld [vmem:[#allocation23_spill] sm:$0xff] }
 0x6c2   :  { %2813 = vmatprep.subr.bf16.mxu0 %v3192_v39 }
 0x777   :  { %v2258_v14 = vpop.f32.mrb[36].mxu0  ;;  %v2299_v3 = vpop.f32.mrb[48].mxu1 }
 0x778   :  { %v2306_v40 = vadd.f32 %v2258_v14, %v3976_v38  ;;  %v2308_v42 = vadd.f32 %v2299_v3, %v3977_v60  ;;  %v2260_v43 = vpop.f32.mrb[37].mxu0  ;;  %v2301_v44 = vpop.f32.mrb[49].mxu1  ;;  %v3982_v3 = vld [vmem:[#allocation33_spill] sm:$0xff] }
 0x779   :  { %v2307_v46 = vadd.f32 %v2260_v43, %v3978_v45  ;;  %v2309_v50 = vadd.f32 %v2301_v44, %v3979_v47  ;;  %v2262_v51 = vpop.f32.mrb[38].mxu0  ;;  %v2303_v48 = vpop.f32.mrb[50].mxu1  ;;  %v3984_v44 = vld [vmem:[#allocation34_spill] sm:$0xff] }
 0x77a   :  { %v2658_v62 = vmul.f32 -1.442695, %v2306_v40  ;;  %v2263_v1 = vpop.f32.mrb[39].mxu0  ;;  %v2304_v52 = vpop.f32.mrb[51].mxu1  ;;  %v2660_v22 = vmul.f32 -1.442695, %v2308_v42 }
 0x77b   :  { %v2659_v49 = vmul.f32 -1.442695, %v2307_v46  ;;  %v3983_v42 = vld [vmem:[#allocation24_spill] sm:$0xff] }
 0x77c   :  { %2997 = vpow2.f32 %v2658_v62 }
 0x77d   :  { %2999 = vpow2.f32 %v2659_v49 }
 0x77e   :  { %3001 = vtanh.f32 %v2309_v50 }
 0x77f   :  { %3003 = vpow2.f32 %v2660_v22 }
 0x786   :  { %v2998_v58 = vpop.eup %2997 }
 0x787   :  { %v2319_v16 = vadd.f32 1.0, %v2998_v58  ;;  %v3000_v56 = vpop.eup %2999 }
 0x788   :  { %v2320_v8 = vadd.f32 1.0, %v3000_v56  ;;  %v3002_v53 = vpop.eup %3001 }
 0x789   :  { %3005 = vrcp.f32 %v2319_v16  ;;  %v3004_v24 = vpop.eup %3003 }
 0x78a   :  { %3007 = vrcp.f32 %v2320_v8  ;;  %v2321_v29 = vadd.f32 1.0, %v3004_v24 }
 0x78c   :  { %3009 = vrcp.f32 %v2321_v29 }
 0x793   :  { %v3006_v25 = vpop.eup %3005 }
 0x794   :  { %v2330_v26 = vmul.f32 %v3006_v25, %v3002_v53  ;;  %v3008_v28 = vpop.eup %3007 }
 0x795   :  { %v2329_v54 = vmul.f32 %v3008_v28, %v3884_v36  ;;  %v2820_v36 = vpack.c.bf16 %v2454_v10, %v2453_v4 }
 0x796   :  { %v3010_v23 = vpop.eup %3009 }
 0x797   :  { %v3909_v30 = vadd.f32 %v2330_v26, %v2329_v54 }
 0x799   :  { %3011 = vtanh.f32 %v3909_v30 }
 0x7a3   :  { %v3012_v31 = vpop.eup %3011 }
 0x7a4   :  { %v2333_v32 = vmul.f32 %v3012_v31, %v3010_v23  ;;  %v2664_v31 = vld [vmem:[%s3938_s5] ss:$0 sm:$0xff] }
 0x7a6   :  { %v2338_v33 = vpack.c.bf16 %v2333_v32, %v2333_v32 }
 0x7a8   :  { %2372 = vmatmul.mubr.bf16.vlgmr.msra.gmra.mrb[40].mxu0 %v2338_v33  ;;  %2413 = vmatmul.mubr.bf16.vlgmr.msra.gmra.mrb[52].mxu1 %v2338_v33 }
 0x7a9   :  { %2815 = vmatpush3.bf16.msra.mxu0 %v2814_v37  ;;  %2714 = vmatprep.mubr.msk.f32.mxu0 %vm3193_vm4, %v3980_v13 }
 0x7aa   :  { %2816 = vmatprep.subr.bf16.mxu0 %v3192_v39 }
 0x7ad   :  { %2818 = vmatpush3.bf16.msra.mxu0 %v2817_v17 }
 0x7ae   :  { %2819 = vmatprep.subr.bf16.mxu0 %v3192_v39 }
 0x7b1   :  { %2821 = vmatpush3.bf16.msra.mxu0 %v2820_v36 }
 0x7b2   :  { %2822 = vmatprep.subr.bf16.mxu0 %v3192_v39 }
 0x7b5   :  { %2824 = vmatpush3.bf16.msra.mxu0 %v2823_v6 }
 0x7b6   :  { %2825 = vmatprep.subr.bf16.mxu0 %v3192_v39 }
 0x7b9   :  { %2827 = vmatpush3.bf16.msra.mxu0 %v2826_v15 }
 0x7ba   :  { %2828 = vmatprep.subr.bf16.mxu0 %v3192_v39 }
 0x7bd   :  { %2830 = vmatpush3.bf16.msra.mxu0 %v2829_v7 }
 0x7be   :  { %2831 = vmatprep.subr.bf16.mxu0 %v3192_v39 }
 0x7c1   :  { %2833 = vmatpush3.bf16.msra.mxu0 %v2832_v18 }
 0x7c2   :  { %2834 = vmatprep.subr.bf16.mxu0 %v3192_v39 }
 0x7c5   :  { %2836 = vmatpush3.bf16.msra.mxu0 %v2835_v2 }
 0x87b   :  { %v2373_v55 = vpop.f32.mrb[40].mxu0  ;;  %v2414_v27 = vpop.f32.mrb[52].mxu1 }
 0x87c   :  { %v2421_v14 = vadd.f32 %v2373_v55, %v3981_v11  ;;  %v2423_v38 = vadd.f32 %v2414_v27, %v3982_v3  ;;  %v2375_v40 = vpop.f32.mrb[41].mxu0  ;;  %v2416_v60 = vpop.f32.mrb[53].mxu1 }
 0x87d   :  { %v2422_v43 = vadd.f32 %v2375_v40, %v3983_v42  ;;  %v2424_v45 = vadd.f32 %v2416_v60, %v3984_v44  ;;  %v2377_v46 = vpop.f32.mrb[42].mxu0  ;;  %v2418_v47 = vpop.f32.mrb[54].mxu1 }
 0x87e   :  { %v2661_v50 = vmul.f32 -1.442695, %v2421_v14  ;;  %v2378_v51 = vpop.f32.mrb[43].mxu0  ;;  %v2419_v48 = vpop.f32.mrb[55].mxu1  ;;  %v2663_v1 = vmul.f32 -1.442695, %v2423_v38 }
 0x87f   :  { %v2662_v62 = vmul.f32 -1.442695, %v2422_v43 }
 0x880   :  { %3013 = vpow2.f32 %v2661_v50 }
 0x881   :  { %3015 = vpow2.f32 %v2662_v62 }
 0x882   :  { %3017 = vtanh.f32 %v2424_v45 }
 0x883   :  { %3019 = vpow2.f32 %v2663_v1 }
 0x88a   :  { %v3014_v52 = vpop.eup %3013 }
 0x88b   :  { %v2434_v49 = vadd.f32 1.0, %v3014_v52  ;;  %v3016_v22 = vpop.eup %3015 }
 0x88c   :  { %v2435_v58 = vadd.f32 1.0, %v3016_v22  ;;  %v3018_v16 = vpop.eup %3017 }
 0x88d   :  { %3021 = vrcp.f32 %v2434_v49  ;;  %v3020_v56 = vpop.eup %3019 }
 0x88e   :  { %3023 = vrcp.f32 %v2435_v58  ;;  %v2436_v25 = vadd.f32 1.0, %v3020_v56 }
 0x890   :  { %3025 = vrcp.f32 %v2436_v25 }
 0x897   :  { %v3022_v8 = vpop.eup %3021 }
 0x898   :  { %v2445_v53 = vmul.f32 %v3022_v8, %v3018_v16  ;;  %v3024_v24 = vpop.eup %3023 }
 0x899   :  { %v2444_v26 = vmul.f32 %v3024_v24, %v3909_v30 }
 0x89a   :  { %v3026_v29 = vpop.eup %3025 }
 0x89b   :  { %v2446_v28 = vadd.f32 %v2445_v53, %v2444_v26 }
 0x89d   :  { %3027 = vtanh.f32 %v2446_v28 }
 0x8a7   :  { %v3028_v54 = vpop.eup %3027 }
 0x8a8   :  { %v2448_v23 = vmul.f32 %v3028_v54, %v3026_v29 }
 0x8aa   :  { %2715 = vmatmul.mubr.f32.vlgmr.msra.gmra.mrb[10].mxu0 %v2448_v23 }
 0x97d   :  { %v2538_v32 = vpop.f32.mrb[10].mxu0 }
 0x97e   :  { %v2539_v33 = vadd.f32 %v2664_v31, %v2538_v32  ;;  %v2716_v34 = vpop.f32.mrb[11].mxu0 }
 0x980   :  { %2542 = vst [vmem:[#allocation11] sm:$0xff] %v2539_v33 }
 0x981   :  { %3160 = shalt.err (!%p3157_p8)
}
 0x982   :  { %s3161_s30 = scalar_lea.hbm %s3939_s6, 128 }
 0x983   :  { %p3162_p9 = scmp.ne.s32.totalorder %s3939_s6, %s3161_s30  ;;  %p3165_p10 = scmp.lt.u32.totalorder %s3161_s30, %s3939_s6 }
 0x985   :  { %p3167_p11 = pnand %p3165_p10, %p3162_p9 }
 0x987   :  { %3170 = shalt.err (!%p3167_p11)
}
 0x988   :  { %2552 = dma.vmem_to_hbm [thread:$0]  %s2550_s26, 128, %s3939_s6, [#allocation5]  }
 0x989   :  { %3177 = dma.done.wait [#allocation5], 128  }
 0x98a   :  { %3178 = vsyncadd [#allocation5], 4294967168 }
 0x98b   :  { %2556 = vsyncpa [#allocation4], 1 }
 0x98c   :  { %2557 = vsyncpa [#allocation7], 1 }
 0x98d   :  { %2558 = vsyncpa [#allocation10], 1 }
 0x98e   :  { %2559 = vsyncpa [#allocation5], 1 }

</bundles_post_ra>
